<compile_context>
chip_gen: v7x
topology: tpu7x:2x2x1
jax: 0.10.0
libtpu: 0.0.40
codegen_flags: <defaults>
</compile_context>

<pallas_src>
import math
import functools

import jax
import jax.numpy as jnp
from jax.experimental import pallas as pl
from jax.experimental.pallas import tpu as pltpu

LN_EPS = 1e-7        # matches nn.LayerNorm(width, eps=1e-07)
NEG_INF = -1e30      # large finite negative (robust vs -inf, no NaN risk)


def _layernorm(v, w, b):
    mu = jnp.mean(v, axis=-1, keepdims=True)
    var = jnp.mean((v - mu) ** 2, axis=-1, keepdims=True)
    return (v - mu) * jax.lax.rsqrt(var + LN_EPS) * w + b


# -----------------------------------------------------------------------------
# Fused transformer-stack kernel: grid = (batch_blocks, layers)
# -----------------------------------------------------------------------------
def _stack_kernel(x_ref, sep_ref,
                  ln1_w_ref, ln1_b_ref,
                  wqkv_ref, bqkv_ref,
                  wout_ref, bout_ref,
                  ln2_w_ref, ln2_b_ref,
                  wfc_ref, bfc_ref,
                  wcp_ref, bcp_ref,
                  o_ref,
                  res_ref, attn_ref, *, n_head):
    l = pl.program_id(1)
    L = pl.num_programs(1)

    # Layer 0: load the residual stream into the persistent f32 VMEM scratch.
    @pl.when(l == 0)
    def _():
        res_ref[...] = x_ref[...]

    x = res_ref[...]                               # (BB, S, D) f32 residual stream
    BB, S, D = x.shape
    H = n_head
    hd = D // H
    M = BB * S

    # ---- attention branch (pre-LN) -----------------------------------------
    xn = _layernorm(x, ln1_w_ref[0], ln1_b_ref[0])                     # f32
    # 1/sqrt(hd) is pre-folded into the Q columns of wqkv / bqkv (wrapper-side).
    qkv = (jnp.dot(xn.reshape(M, D).astype(jnp.bfloat16), wqkv_ref[0],
                   preferred_element_type=jnp.float32)
           + bqkv_ref[0]).astype(jnp.bfloat16)                         # (M, 3D) bf16
    qkv = qkv.reshape(BB, S, 3 * D)
    # slice Q/K/V as contiguous slabs first (128-lane aligned when D % 128 == 0)
    q = qkv[:, :, :D]
    k = qkv[:, :, D:2 * D]
    v = qkv[:, :, 2 * D:]

    # causal mask built in-kernel (saves an (S,S) mask input + its per-step DMA)
    rows = jax.lax.broadcasted_iota(jnp.int32, (S, S), 0)
    cols = jax.lax.broadcasted_iota(jnp.int32, (S, S), 1)
    causal = (cols > rows)[None]                                       # (1, S, S)

    # static head loop; each head's result retires straight into the bf16 scratch.
    # TODO(synk): when hd is not a multiple of 128 the per-head slices start at
    #             misaligned lane offsets; a head-pair-packed weight layout would
    #             remove the remaining relayouts.
    for h in range(H):
        sl = slice(h * hd, (h + 1) * hd)
        logits = jnp.einsum('bqd,bkd->bqk', q[:, :, sl], k[:, :, sl],
                            preferred_element_type=jnp.float32)        # (BB,S,S) f32
        logits = jnp.where(causal, NEG_INF, logits)
        logits = logits - jnp.max(logits, axis=-1, keepdims=True)
        p = jnp.exp(logits)
        p = p * pl.reciprocal(jnp.sum(p, axis=-1, keepdims=True), approx=True)
        head = jnp.einsum('bqk,bkd->bqd', p.astype(jnp.bfloat16), v[:, :, sl],
                          preferred_element_type=jnp.float32)
        attn_ref[:, :, sl] = head.astype(jnp.bfloat16)

    y = jnp.dot(attn_ref[...].reshape(M, D), wout_ref[0],
                preferred_element_type=jnp.float32) + bout_ref[0]      # (M, D) f32
    x = x + y.reshape(BB, S, D)

    # ---- MLP branch (pre-LN, QuickGELU) ------------------------------------
    xn2 = _layernorm(x, ln2_w_ref[0], ln2_b_ref[0])
    h1 = jnp.dot(xn2.reshape(M, D).astype(jnp.bfloat16), wfc_ref[0],
                 preferred_element_type=jnp.float32) + bfc_ref[0]      # (M, 4D) f32
    h1 = (h1 * jax.nn.sigmoid(1.702 * h1)).astype(jnp.bfloat16)        # QuickGELU -> bf16
    h2 = jnp.dot(h1, wcp_ref[0],
                 preferred_element_type=jnp.float32) + bcp_ref[0]      # (M, D) f32
    x = x + h2.reshape(BB, S, D)

    res_ref[...] = x

    # Last layer: gather the tail ([SEP]) token per row via the one-hot selector
    # and write only (BB, 1, D) to HBM.
    @pl.when(l == L - 1)
    def _():
        o_ref[...] = jnp.sum(sep_ref[...] * x, axis=1, keepdims=True)  # (BB,1,D) f32


# -----------------------------------------------------------------------------
# Generation-aware VMEM budget + batch-block sizing
# -----------------------------------------------------------------------------
def _vmem_budget_bytes():
    try:
        cap = int(pltpu.get_tpu_info().vmem_capacity_bytes)
    except Exception:
        cap = 64 * 1024 * 1024          # conservative fallback (safe on all gens)
    if cap <= 64 * 1024 * 1024:         # v7x-class: leave ~8 MiB compiler headroom
        return max(cap - 8 * 1024 * 1024, 32 * 1024 * 1024)
    # v5e/v6e (128 MiB physical): allow up to ~104 MiB scoped VMEM
    return min(cap - 24 * 1024 * 1024, 104 * 1024 * 1024)


def _working_set_bytes(bb, S, D):
    M = bb * S
    weights = 2 * 12 * D * D * 2            # double-buffered bf16 weight blocks
    vectors = 2 * 14 * D * 4                # double-buffered biases / LN params (f32)
    x_in = 2 * bb * S * D * 4               # x input blocks (double-buffered f32)
    onehot = 2 * bb * S * 4
    out = 2 * bb * D * 4                    # tail output blocks
    resid = bb * S * D * 4                  # residual scratch (f32)
    attn = bb * S * D * 2                   # attention scratch (bf16)
    interm = (M * 3 * D * 2                 # qkv bf16
              + M * 4 * D * 4               # h1 f32
              + M * 4 * D * 2               # h1 bf16
              + 2 * M * D * 4               # xn / y / h2 style temporaries
              + 2 * bb * S * S * 4)         # per-head logits / probs
    return int((weights + vectors + x_in + onehot + out + resid + attn + interm) * 1.3)


def _pick_block_b(B, S, D, budget, prefer_multi_block):
    divisors = sorted((d for d in range(1, B + 1) if B % d == 0), reverse=True)
    if prefer_multi_block and B >= 2:
        multi = [d for d in divisors if B // d >= 2]
        divisors = multi + [d for d in divisors if d not in multi]
    for d in divisors:                      # largest bb whose working set fits VMEM
        if _working_set_bytes(d, S, D) <= budget:
            return d
    return 1


# -----------------------------------------------------------------------------
# One fused pallas_call over (batch_blocks, layers); returns the (B, D) tail tokens
# -----------------------------------------------------------------------------
def transformer_stack(x, onehot, kp, n_head, *, block_b=None):
    B, S, D = x.shape
    L = kp['ln1_w'].shape[0]
    budget = _vmem_budget_bytes()
    small_vmem = budget <= 60 * 1024 * 1024           # v7x-class heuristic
    bb = block_b or _pick_block_b(B, S, D, budget, prefer_multi_block=small_vmem)
    grid = (B // bb, L)

    def xmap(b, l):
        return (b, 0, 0)

    def wmap(b, l):
        return (l, 0, 0)

    in_specs = [
        pl.BlockSpec((bb, S, D), xmap),            # x (initial residual stream)
        pl.BlockSpec((bb, S, 1), xmap),            # one-hot SEP selector
        pl.BlockSpec((1, 1, D), wmap),             # ln_1 weight
        pl.BlockSpec((1, 1, D), wmap),             # ln_1 bias
        pl.BlockSpec((1, D, 3 * D), wmap),         # in_proj W^T  (bf16, Q pre-scaled)
        pl.BlockSpec((1, 1, 3 * D), wmap),         # in_proj bias (Q pre-scaled)
        pl.BlockSpec((1, D, D), wmap),             # out_proj W^T (bf16)
        pl.BlockSpec((1, 1, D), wmap),             # out_proj bias
        pl.BlockSpec((1, 1, D), wmap),             # ln_2 weight
        pl.BlockSpec((1, 1, D), wmap),             # ln_2 bias
        pl.BlockSpec((1, D, 4 * D), wmap),         # mlp.c_fc W^T   (bf16)
        pl.BlockSpec((1, 1, 4 * D), wmap),         # mlp.c_fc bias
        pl.BlockSpec((1, 4 * D, D), wmap),         # mlp.c_proj W^T (bf16)
        pl.BlockSpec((1, 1, D), wmap),             # mlp.c_proj bias
    ]

    est = _working_set_bytes(bb, S, D)
    vmem_limit = int(min(max(est, 32 * 1024 * 1024), budget))

    out = pl.pallas_call(
        functools.partial(_stack_kernel, n_head=n_head),
        out_shape=jax.ShapeDtypeStruct((B, 1, D), jnp.float32),
        grid=grid,
        in_specs=in_specs,
        out_specs=pl.BlockSpec((bb, 1, D), xmap),
        scratch_shapes=[pltpu.VMEM((bb, S, D), jnp.float32),    # residual stream
                        pltpu.VMEM((bb, S, D), jnp.bfloat16)],  # attention output
        compiler_params=pltpu.CompilerParams(
            dimension_semantics=("parallel", "arbitrary"),
            vmem_limit_bytes=vmem_limit),
    )(x, onehot,
      kp['ln1_w'], kp['ln1_b'],
      kp['wqkv_t'], kp['bqkv'],
      kp['wout_t'], kp['bout'],
      kp['ln2_w'], kp['ln2_b'],
      kp['wfc_t'], kp['bfc'],
      kp['wcproj_t'], kp['bcproj'])
    return out[:, 0, :]


# -----------------------------------------------------------------------------
# Wrapper-side layout plumbing (free): stack per-layer params along a leading L
# axis, pre-transpose Linear weights to (K, N), cast matmul weights to bf16 and
# fold the 1/sqrt(head_dim) attention scale into the Q part of in_proj.
# -----------------------------------------------------------------------------
def prepare_kernel_params(params, n_head):
    layers = params['layers']
    D = layers[0]['ln1_w'].shape[0]
    hd = D // n_head
    scale = 1.0 / math.sqrt(hd)

    def stack(k):
        return jnp.stack([lp[k] for lp in layers], axis=0)

    wqkv = stack('inproj_w')                                   # (L, 3D, D) torch (out,in)
    bqkv = stack('inproj_b')                                   # (L, 3D)
    qscale = jnp.concatenate([jnp.full((D,), scale, jnp.float32),
                              jnp.ones((2 * D,), jnp.float32)], axis=0)
    wqkv = wqkv * qscale[None, :, None]
    bqkv = bqkv * qscale[None, :]

    return dict(
        ln1_w=stack('ln1_w')[:, None, :].astype(jnp.float32),
        ln1_b=stack('ln1_b')[:, None, :].astype(jnp.float32),
        wqkv_t=jnp.swapaxes(wqkv, 1, 2).astype(jnp.bfloat16),               # (L, D, 3D)
        bqkv=bqkv[:, None, :].astype(jnp.float32),                          # (L, 1, 3D)
        wout_t=jnp.swapaxes(stack('outproj_w'), 1, 2).astype(jnp.bfloat16),  # (L, D, D)
        bout=stack('outproj_b')[:, None, :].astype(jnp.float32),
        ln2_w=stack('ln2_w')[:, None, :].astype(jnp.float32),
        ln2_b=stack('ln2_b')[:, None, :].astype(jnp.float32),
        wfc_t=jnp.swapaxes(stack('fc_w'), 1, 2).astype(jnp.bfloat16),        # (L, D, 4D)
        bfc=stack('fc_b')[:, None, :].astype(jnp.float32),
        wcproj_t=jnp.swapaxes(stack('cproj_w'), 1, 2).astype(jnp.bfloat16),  # (L, 4D, D)
        bcproj=stack('cproj_b')[:, None, :].astype(jnp.float32),
    )


# -----------------------------------------------------------------------------
# Full TextTransformer forward
# -----------------------------------------------------------------------------
def text_transformer_forward(tokens, params, n_head):
    B, S = tokens.shape
    D = params['embedding_table'].shape[1]
    kp = prepare_kernel_params(params, n_head)

    # embedding lookup + positional embedding (plain-JAX glue)
    x = jnp.take(params['embedding_table'], tokens.reshape(-1), axis=0).reshape(B, S, D)
    x = x + params['positional_embedding']

    # tail-token selection as a one-hot selector consumed inside the kernel.
    # TODO(synk): PyTorch's nonzero() supports a variable number of 102 tokens per
    #             row; that has no static-shape JAX equivalent, so exactly one per
    #             row is assumed (first occurrence).
    idx = jnp.argmax(tokens == 102, axis=1)                            # (B,)
    onehot = (jnp.arange(S)[None, :] == idx[:, None]).astype(jnp.float32)[..., None]

    # PyTorch permutes to (S, B, D) and back; attention is batch-independent, so we
    # stay in (B, S, D).  The kernel returns only the (B, D) tail tokens.
    tail = transformer_stack(x, onehot, kp, n_head)

    # Final LayerNorm + text_projection on (B, out_dim): intentionally plain XLA —
    # a Pallas launch here only adds overhead.
    tail = _layernorm(tail, params['ln_final_w'], params['ln_final_b'])
    return tail @ params['text_projection']


# -----------------------------------------------------------------------------
# Pure-JAX reference. matmul_dtype=bfloat16 mirrors the kernel's precision policy
# (bf16 matmul inputs, f32 accumulation, everything else in f32); matmul_dtype=f32
# is the exact PyTorch-style reference.
# -----------------------------------------------------------------------------
def ref_forward(tokens, params, n_head, matmul_dtype=jnp.float32):
    B, S = tokens.shape
    D = params['embedding_table'].shape[1]
    hd = D // n_head
    md = matmul_dtype
    x = jnp.take(params['embedding_table'], tokens.reshape(-1), axis=0).reshape(B, S, D)
    x = x + params['positional_embedding']
    r = jnp.arange(S)
    mask = jnp.where(r[None, :] > r[:, None], NEG_INF, 0.0).astype(jnp.float32)

    def lin(v, w, b):   # v @ w.T + b (w stored PyTorch-style as (out, in))
        return jnp.einsum('bsi,oi->bso', v.astype(md), w.astype(md),
                          preferred_element_type=jnp.float32) + b

    for p in params['layers']:
        xn = _layernorm(x, p['ln1_w'], p['ln1_b'])
        qkv = lin(xn, p['inproj_w'], p['inproj_b'])
        q, k, v = jnp.split(qkv, 3, axis=-1)
        q = (q * (1.0 / math.sqrt(hd))).reshape(B, S, n_head, hd)
        k = k.reshape(B, S, n_head, hd)
        v = v.reshape(B, S, n_head, hd)
        logits = jnp.einsum('bqhd,bkhd->bhqk', q.astype(md), k.astype(md),
                            preferred_element_type=jnp.float32) + mask
        w = jax.nn.softmax(logits, axis=-1)
        attn = jnp.einsum('bhqk,bkhd->bqhd', w.astype(md), v.astype(md),
                          preferred_element_type=jnp.float32).reshape(B, S, D)
        x = x + lin(attn, p['outproj_w'], p['outproj_b'])
        xn2 = _layernorm(x, p['ln2_w'], p['ln2_b'])
        h = lin(xn2, p['fc_w'], p['fc_b'])
        h = h * jax.nn.sigmoid(1.702 * h)
        x = x + lin(h, p['cproj_w'], p['cproj_b'])

    x = _layernorm(x, params['ln_final_w'], params['ln_final_b'])
    idx = jnp.argmax(tokens == 102, axis=1)
    tail = x[jnp.arange(B), idx]
    return tail @ params['text_projection']


# -----------------------------------------------------------------------------
# Deterministic parameter init (synthetic; shapes follow the module __init__)
# -----------------------------------------------------------------------------
def init_params(key, *, context_length, vocab_size, output_dim, width, layers):
    D = width
    keys = jax.random.split(key, 4 + layers)
    layer_params = []
    for l in range(layers):
        lk = jax.random.split(keys[4 + l], 12)
        layer_params.append(dict(
            ln1_w=1.0 + 0.05 * jax.random.normal(lk[0], (D,), jnp.float32),
            ln1_b=0.05 * jax.random.normal(lk[1], (D,), jnp.float32),
            inproj_w=0.02 * jax.random.normal(lk[2], (3 * D, D), jnp.float32),
            inproj_b=0.02 * jax.random.normal(lk[3], (3 * D,), jnp.float32),
            outproj_w=0.02 * jax.random.normal(lk[4], (D, D), jnp.float32),
            outproj_b=0.02 * jax.random.normal(lk[5], (D,), jnp.float32),
            ln2_w=1.0 + 0.05 * jax.random.normal(lk[6], (D,), jnp.float32),
            ln2_b=0.05 * jax.random.normal(lk[7], (D,), jnp.float32),
            fc_w=0.02 * jax.random.normal(lk[8], (4 * D, D), jnp.float32),
            fc_b=0.02 * jax.random.normal(lk[9], (4 * D,), jnp.float32),
            cproj_w=0.02 * jax.random.normal(lk[10], (D, 4 * D), jnp.float32),
            cproj_b=0.02 * jax.random.normal(lk[11], (D,), jnp.float32),
        ))
    return dict(
        embedding_table=0.02 * jax.random.normal(keys[0], (vocab_size, D), jnp.float32),
        positional_embedding=0.01 * jax.random.normal(keys[1], (context_length, D), jnp.float32),
        text_projection=(D ** -0.5) * jax.random.normal(keys[2], (D, output_dim), jnp.float32),
        ln_final_w=1.0 + 0.05 * jax.random.normal(keys[3], (D,), jnp.float32),
        ln_final_b=jnp.zeros((D,), jnp.float32),
        layers=layer_params,
    )


if __name__ == "__main__":
    context_length, vocab_size, output_dim, width, layers, heads = 8, 128, 16, 32, 2, 4
    B = 2

    key = jax.random.PRNGKey(0)
    pkey, tkey = jax.random.split(key)
    params = init_params(pkey, context_length=context_length, vocab_size=vocab_size,
                         output_dim=output_dim, width=width, layers=layers)

    # token ids in [0, 100) plus exactly one [SEP]=102 tail token per row
    tokens = jax.random.randint(tkey, (B, context_length), 0, 100, dtype=jnp.int32)
    tokens = tokens.at[0, 5].set(102)
    tokens = tokens.at[1, 7].set(102)

    fwd = jax.jit(lambda t, p: text_transformer_forward(t, p, heads))
    out = jax.block_until_ready(fwd(tokens, params))

    assert out.shape == (B, output_dim), out.shape
    assert bool(jnp.all(jnp.isfinite(out)))

    # tight check vs a reference that follows the kernel's bf16-matmul / f32-accumulate policy
    ref_bf16 = ref_forward(tokens, params, heads, matmul_dtype=jnp.bfloat16)
    err_bf16 = float(jnp.max(jnp.abs(out - ref_bf16)))
    assert err_bf16 < 2e-2, f"mismatch vs bf16-policy reference: {err_bf16}"

    # sanity check vs the full-f32 reference (bounds total bf16 quantization error)
    ref_f32 = ref_forward(tokens, params, heads, matmul_dtype=jnp.float32)
    err_f32 = float(jnp.max(jnp.abs(out - ref_f32)))
    assert err_f32 < 2e-1, f"mismatch vs f32 reference: {err_f32}"

    print("KERNEL_OK")
</pallas_src>

<mosaic_0001>
module attributes {stable_mosaic.version = 11 : i64} {
  func.func @_stack_kernel(%arg0: i32, %arg1: i32, %arg2: memref<1x8x32xf32, #tpu.memory_space<vmem>>, %arg3: memref<1x8x1xf32, #tpu.memory_space<vmem>>, %arg4: memref<1x1x32xf32, #tpu.memory_space<vmem>>, %arg5: memref<1x1x32xf32, #tpu.memory_space<vmem>>, %arg6: memref<1x32x96xbf16, #tpu.memory_space<vmem>>, %arg7: memref<1x1x96xf32, #tpu.memory_space<vmem>>, %arg8: memref<1x32x32xbf16, #tpu.memory_space<vmem>>, %arg9: memref<1x1x32xf32, #tpu.memory_space<vmem>>, %arg10: memref<1x1x32xf32, #tpu.memory_space<vmem>>, %arg11: memref<1x1x32xf32, #tpu.memory_space<vmem>>, %arg12: memref<1x32x128xbf16, #tpu.memory_space<vmem>>, %arg13: memref<1x1x128xf32, #tpu.memory_space<vmem>>, %arg14: memref<1x128x32xbf16, #tpu.memory_space<vmem>>, %arg15: memref<1x1x32xf32, #tpu.memory_space<vmem>>, %arg16: memref<1x1x32xf32, #tpu.memory_space<vmem>>, %arg17: memref<1x8x32xf32, #tpu.memory_space<vmem>>, %arg18: memref<1x8x32xbf16, #tpu.memory_space<vmem>>) attributes {dimension_semantics = [#tpu.dimension_semantics<parallel>, #tpu.dimension_semantics<arbitrary>], iteration_bounds = array<i64: 2, 2>, scalar_prefetch = 0 : i64, scratch_operands = 2 : i64, tpu.core_type = #tpu.core_type<tc>, window_params = [{transform_indices = @transform_0, window_bounds = array<i64: 1, 8, 32>}, {transform_indices = @transform_1, window_bounds = array<i64: 1, 8, 1>}, {transform_indices = @transform_2, window_bounds = array<i64: 1, 1, 32>}, {transform_indices = @transform_3, window_bounds = array<i64: 1, 1, 32>}, {transform_indices = @transform_4, window_bounds = array<i64: 1, 32, 96>}, {transform_indices = @transform_5, window_bounds = array<i64: 1, 1, 96>}, {transform_indices = @transform_6, window_bounds = array<i64: 1, 32, 32>}, {transform_indices = @transform_7, window_bounds = array<i64: 1, 1, 32>}, {transform_indices = @transform_8, window_bounds = array<i64: 1, 1, 32>}, {transform_indices = @transform_9, window_bounds = array<i64: 1, 1, 32>}, {transform_indices = @transform_10, window_bounds = array<i64: 1, 32, 128>}, {transform_indices = @transform_11, window_bounds = array<i64: 1, 1, 128>}, {transform_indices = @transform_12, window_bounds = array<i64: 1, 128, 32>}, {transform_indices = @transform_13, window_bounds = array<i64: 1, 1, 32>}, {transform_indices = @transform_14, window_bounds = array<i64: 1, 1, 32>}]} {
    %c0_i32 = arith.constant 0 : i32
    %0 = arith.cmpi eq, %arg1, %c0_i32 : i32
    %1 = arith.extui %0 : i1 to i32
    %c0_i32_0 = arith.constant 0 : i32
    %2 = arith.cmpi ne, %1, %c0_i32_0 : i32
    scf.if %2 {
      %c0_90 = arith.constant 0 : index
      %c0_91 = arith.constant 0 : index
      %c0_92 = arith.constant 0 : index
      %200 = vector.load %arg2[%c0_90, %c0_91, %c0_92] : memref<1x8x32xf32, #tpu.memory_space<vmem>>, vector<1x8x32xf32>
      %c0_93 = arith.constant 0 : index
      %c0_94 = arith.constant 0 : index
      %c0_95 = arith.constant 0 : index
      %201 = vector.load %arg17[%c0_93, %c0_94, %c0_95] : memref<1x8x32xf32, #tpu.memory_space<vmem>>, vector<1x8x32xf32>
      tpu.vector_store %arg17[%c0_93, %c0_94, %c0_95], %200 {strides = array<i32>} : memref<1x8x32xf32, #tpu.memory_space<vmem>>, vector<1x8x32xf32>,
    } else {
    }
    %c0 = arith.constant 0 : index
    %c0_1 = arith.constant 0 : index
    %c0_2 = arith.constant 0 : index
    %3 = vector.load %arg17[%c0, %c0_1, %c0_2] : memref<1x8x32xf32, #tpu.memory_space<vmem>>, vector<1x8x32xf32>
    %c0_3 = arith.constant 0 : index
    %c0_4 = arith.constant 0 : index
    %c0_5 = arith.constant 0 : index
    %4 = vector.load %arg4[%c0_3, %c0_4, %c0_5] : memref<1x1x32xf32, #tpu.memory_space<vmem>>, vector<1x1x32xf32>
    %5 = vector.shape_cast %4 : vector<1x1x32xf32> to vector<1x32xf32>
    %c0_6 = arith.constant 0 : index
    %c0_7 = arith.constant 0 : index
    %c0_8 = arith.constant 0 : index
    %6 = vector.load %arg5[%c0_6, %c0_7, %c0_8] : memref<1x1x32xf32, #tpu.memory_space<vmem>>, vector<1x1x32xf32>
    %7 = vector.shape_cast %6 : vector<1x1x32xf32> to vector<1x32xf32>
    %cst = arith.constant dense<0.000000e+00> : vector<1x8xf32>
    %8 = vector.multi_reduction <add>, %3, %cst [2] : vector<1x8x32xf32> to vector<1x8xf32>
    %9 = vector.shape_cast %8 : vector<1x8xf32> to vector<1x8x1xf32>
    %cst_9 = arith.constant 3.200000e+01 : f32
    %10 = vector.broadcast %cst_9 : f32 to vector<1x8x1xf32>
    %11 = arith.divf %9, %10 : vector<1x8x1xf32>
    %12 = vector.broadcast %11 : vector<1x8x1xf32> to vector<1x8x32xf32>
    %13 = arith.subf %3, %12 : vector<1x8x32xf32>
    %14 = arith.mulf %13, %13 : vector<1x8x32xf32>
    %cst_10 = arith.constant dense<0.000000e+00> : vector<1x8xf32>
    %15 = vector.multi_reduction <add>, %14, %cst_10 [2] : vector<1x8x32xf32> to vector<1x8xf32>
    %16 = vector.shape_cast %15 : vector<1x8xf32> to vector<1x8x1xf32>
    %cst_11 = arith.constant 3.200000e+01 : f32
    %17 = vector.broadcast %cst_11 : f32 to vector<1x8x1xf32>
    %18 = arith.divf %16, %17 : vector<1x8x1xf32>
    %19 = vector.broadcast %11 : vector<1x8x1xf32> to vector<1x8x32xf32>
    %20 = arith.subf %3, %19 : vector<1x8x32xf32>
    %cst_12 = arith.constant 1.000000e-07 : f32
    %21 = vector.broadcast %cst_12 : f32 to vector<1x8x1xf32>
    %22 = arith.addf %18, %21 : vector<1x8x1xf32>
    %23 = math.rsqrt %22 : vector<1x8x1xf32>
    %24 = vector.broadcast %23 : vector<1x8x1xf32> to vector<1x8x32xf32>
    %25 = arith.mulf %20, %24 : vector<1x8x32xf32>
    %26 = vector.shape_cast %5 : vector<1x32xf32> to vector<1x1x32xf32>
    %27 = vector.broadcast %26 : vector<1x1x32xf32> to vector<1x8x32xf32>
    %28 = arith.mulf %25, %27 : vector<1x8x32xf32>
    %29 = vector.shape_cast %7 : vector<1x32xf32> to vector<1x1x32xf32>
    %30 = vector.broadcast %29 : vector<1x1x32xf32> to vector<1x8x32xf32>
    %31 = arith.addf %28, %30 : vector<1x8x32xf32>
    %32 = vector.shape_cast %31 : vector<1x8x32xf32> to vector<8x32xf32>
    %33 = arith.truncf %32 : vector<8x32xf32> to vector<8x32xbf16>
    %c0_13 = arith.constant 0 : index
    %c0_14 = arith.constant 0 : index
    %c0_15 = arith.constant 0 : index
    %34 = vector.load %arg6[%c0_13, %c0_14, %c0_15] : memref<1x32x96xbf16, #tpu.memory_space<vmem>>, vector<1x32x96xbf16>
    %35 = vector.shape_cast %34 : vector<1x32x96xbf16> to vector<32x96xbf16>
    %cst_16 = arith.constant dense<0.000000e+00> : vector<8x96xf32>
    %36 = tpu.matmul %33, %35, %cst_16 {dimension_numbers = #tpu.dot_dimension_numbers<[1], [0], [0], [1], [0, 0, 1, 1], [], []>} : vector<8x32xbf16>, vector<32x96xbf16>, vector<8x96xf32> -> vector<8x96xf32>
    %c0_17 = arith.constant 0 : index
    %c0_18 = arith.constant 0 : index
    %c0_19 = arith.constant 0 : index
    %37 = vector.load %arg7[%c0_17, %c0_18, %c0_19] : memref<1x1x96xf32, #tpu.memory_space<vmem>>, vector<1x1x96xf32>
    %38 = vector.shape_cast %37 : vector<1x1x96xf32> to vector<1x96xf32>
    %39 = vector.broadcast %38 : vector<1x96xf32> to vector<8x96xf32>
    %40 = arith.addf %36, %39 : vector<8x96xf32>
    %41 = arith.truncf %40 : vector<8x96xf32> to vector<8x96xbf16>
    %42 = vector.shape_cast %41 : vector<8x96xbf16> to vector<1x8x96xbf16>
    %43 = vector.extract_strided_slice %42 {offsets = [0, 0, 0], sizes = [1, 8, 32], strides = [1, 1, 1]} : vector<1x8x96xbf16> to vector<1x8x32xbf16>
    %44 = vector.extract_strided_slice %42 {offsets = [0, 0, 32], sizes = [1, 8, 32], strides = [1, 1, 1]} : vector<1x8x96xbf16> to vector<1x8x32xbf16>
    %45 = vector.extract_strided_slice %42 {offsets = [0, 0, 64], sizes = [1, 8, 32], strides = [1, 1, 1]} : vector<1x8x96xbf16> to vector<1x8x32xbf16>
    %46 = tpu.iota {dimensions = array<i32: 0>} : vector<8x8xi32>
    %47 = tpu.iota {dimensions = array<i32: 1>} : vector<8x8xi32>
    %48 = arith.cmpi sgt, %47, %46 : vector<8x8xi32>
    %49 = vector.shape_cast %48 : vector<8x8xi1> to vector<1x8x8xi1>
    %50 = vector.extract_strided_slice %43 {offsets = [0, 0, 0], sizes = [1, 8, 8], strides = [1, 1, 1]} : vector<1x8x32xbf16> to vector<1x8x8xbf16>
    %51 = vector.extract_strided_slice %44 {offsets = [0, 0, 0], sizes = [1, 8, 8], strides = [1, 1, 1]} : vector<1x8x32xbf16> to vector<1x8x8xbf16>
    "tpu.trace_start"() <{level = 10 : i32, message = "bqd,bkd->bqk"}> : () -> ()
    %cst_20 = arith.constant dense<0.000000e+00> : vector<1x8x8xf32>
    %52 = tpu.matmul %50, %51, %cst_20 {dimension_numbers = #tpu.dot_dimension_numbers<[2], [2], [1], [1], [0, 0, 0, 1, 1, 1], [0], [0]>} : vector<1x8x8xbf16>, vector<1x8x8xbf16>, vector<1x8x8xf32> -> vector<1x8x8xf32>
    %cst_21 = arith.constant -1.000000e+30 : f32
    "tpu.trace_stop"() : () -> ()
    %53 = vector.broadcast %cst_21 : f32 to vector<1x8x8xf32>
    %54 = arith.select %49, %53, %52 : vector<1x8x8xi1>, vector<1x8x8xf32>
    %cst_22 = arith.constant dense<0xFF800000> : vector<1x8xf32>
    %55 = vector.multi_reduction <maximumf>, %54, %cst_22 [2] : vector<1x8x8xf32> to vector<1x8xf32>
    %56 = vector.shape_cast %55 : vector<1x8xf32> to vector<1x8x1xf32>
    %57 = vector.broadcast %56 : vector<1x8x1xf32> to vector<1x8x8xf32>
    %58 = arith.subf %54, %57 : vector<1x8x8xf32>
    %59 = math.exp %58 : vector<1x8x8xf32>
    %cst_23 = arith.constant dense<0.000000e+00> : vector<1x8xf32>
    %60 = vector.multi_reduction <add>, %59, %cst_23 [2] : vector<1x8x8xf32> to vector<1x8xf32>
    %61 = vector.shape_cast %60 : vector<1x8xf32> to vector<1x8x1xf32>
    %62 = tpu.reciprocal %61 {approx = true} : vector<1x8x1xf32> -> vector<1x8x1xf32>
    %63 = vector.broadcast %62 : vector<1x8x1xf32> to vector<1x8x8xf32>
    %64 = arith.mulf %59, %63 : vector<1x8x8xf32>
    %65 = arith.truncf %64 : vector<1x8x8xf32> to vector<1x8x8xbf16>
    %66 = vector.extract_strided_slice %45 {offsets = [0, 0, 0], sizes = [1, 8, 8], strides = [1, 1, 1]} : vector<1x8x32xbf16> to vector<1x8x8xbf16>
    "tpu.trace_start"() <{level = 10 : i32, message = "bqk,bkd->bqd"}> : () -> ()
    %cst_24 = arith.constant dense<0.000000e+00> : vector<1x8x8xf32>
    %67 = tpu.matmul %65, %66, %cst_24 {dimension_numbers = #tpu.dot_dimension_numbers<[2], [1], [1], [2], [0, 0, 0, 1, 1, 2], [0], [0]>} : vector<1x8x8xbf16>, vector<1x8x8xbf16>, vector<1x8x8xf32> -> vector<1x8x8xf32>
    "tpu.trace_stop"() : () -> ()
    %68 = arith.truncf %67 : vector<1x8x8xf32> to vector<1x8x8xbf16>
    %c0_25 = arith.constant 0 : index
    %c0_26 = arith.constant 0 : index
    %c0_27 = arith.constant 0 : index
    %69 = vector.load %arg18[%c0_25, %c0_26, %c0_27] : memref<1x8x32xbf16, #tpu.memory_space<vmem>>, vector<1x8x8xbf16>
    tpu.vector_store %arg18[%c0_25, %c0_26, %c0_27], %68 {strides = array<i32>} : memref<1x8x32xbf16, #tpu.memory_space<vmem>>, vector<1x8x8xbf16>,
    %70 = vector.extract_strided_slice %43 {offsets = [0, 0, 8], sizes = [1, 8, 8], strides = [1, 1, 1]} : vector<1x8x32xbf16> to vector<1x8x8xbf16>
    %71 = vector.extract_strided_slice %44 {offsets = [0, 0, 8], sizes = [1, 8, 8], strides = [1, 1, 1]} : vector<1x8x32xbf16> to vector<1x8x8xbf16>
    "tpu.trace_start"() <{level = 10 : i32, message = "bqd,bkd->bqk"}> : () -> ()
    %cst_28 = arith.constant dense<0.000000e+00> : vector<1x8x8xf32>
    %72 = tpu.matmul %70, %71, %cst_28 {dimension_numbers = #tpu.dot_dimension_numbers<[2], [2], [1], [1], [0, 0, 0, 1, 1, 1], [0], [0]>} : vector<1x8x8xbf16>, vector<1x8x8xbf16>, vector<1x8x8xf32> -> vector<1x8x8xf32>
    %cst_29 = arith.constant -1.000000e+30 : f32
    "tpu.trace_stop"() : () -> ()
    %73 = vector.broadcast %cst_29 : f32 to vector<1x8x8xf32>
    %74 = arith.select %49, %73, %72 : vector<1x8x8xi1>, vector<1x8x8xf32>
    %cst_30 = arith.constant dense<0xFF800000> : vector<1x8xf32>
    %75 = vector.multi_reduction <maximumf>, %74, %cst_30 [2] : vector<1x8x8xf32> to vector<1x8xf32>
    %76 = vector.shape_cast %75 : vector<1x8xf32> to vector<1x8x1xf32>
    %77 = vector.broadcast %76 : vector<1x8x1xf32> to vector<1x8x8xf32>
    %78 = arith.subf %74, %77 : vector<1x8x8xf32>
    %79 = math.exp %78 : vector<1x8x8xf32>
    %cst_31 = arith.constant dense<0.000000e+00> : vector<1x8xf32>
    %80 = vector.multi_reduction <add>, %79, %cst_31 [2] : vector<1x8x8xf32> to vector<1x8xf32>
    %81 = vector.shape_cast %80 : vector<1x8xf32> to vector<1x8x1xf32>
    %82 = tpu.reciprocal %81 {approx = true} : vector<1x8x1xf32> -> vector<1x8x1xf32>
    %83 = vector.broadcast %82 : vector<1x8x1xf32> to vector<1x8x8xf32>
    %84 = arith.mulf %79, %83 : vector<1x8x8xf32>
    %85 = arith.truncf %84 : vector<1x8x8xf32> to vector<1x8x8xbf16>
    %86 = vector.extract_strided_slice %45 {offsets = [0, 0, 8], sizes = [1, 8, 8], strides = [1, 1, 1]} : vector<1x8x32xbf16> to vector<1x8x8xbf16>
    "tpu.trace_start"() <{level = 10 : i32, message = "bqk,bkd->bqd"}> : () -> ()
    %cst_32 = arith.constant dense<0.000000e+00> : vector<1x8x8xf32>
    %87 = tpu.matmul %85, %86, %cst_32 {dimension_numbers = #tpu.dot_dimension_numbers<[2], [1], [1], [2], [0, 0, 0, 1, 1, 2], [0], [0]>} : vector<1x8x8xbf16>, vector<1x8x8xbf16>, vector<1x8x8xf32> -> vector<1x8x8xf32>
    "tpu.trace_stop"() : () -> ()
    %88 = arith.truncf %87 : vector<1x8x8xf32> to vector<1x8x8xbf16>
    %c0_33 = arith.constant 0 : index
    %c0_34 = arith.constant 0 : index
    %c8 = arith.constant 8 : index
    %89 = vector.load %arg18[%c0_33, %c0_34, %c8] : memref<1x8x32xbf16, #tpu.memory_space<vmem>>, vector<1x8x8xbf16>
    tpu.vector_store %arg18[%c0_33, %c0_34, %c8], %88 {strides = array<i32>} : memref<1x8x32xbf16, #tpu.memory_space<vmem>>, vector<1x8x8xbf16>,
    %90 = vector.extract_strided_slice %43 {offsets = [0, 0, 16], sizes = [1, 8, 8], strides = [1, 1, 1]} : vector<1x8x32xbf16> to vector<1x8x8xbf16>
    %91 = vector.extract_strided_slice %44 {offsets = [0, 0, 16], sizes = [1, 8, 8], strides = [1, 1, 1]} : vector<1x8x32xbf16> to vector<1x8x8xbf16>
    "tpu.trace_start"() <{level = 10 : i32, message = "bqd,bkd->bqk"}> : () -> ()
    %cst_35 = arith.constant dense<0.000000e+00> : vector<1x8x8xf32>
    %92 = tpu.matmul %90, %91, %cst_35 {dimension_numbers = #tpu.dot_dimension_numbers<[2], [2], [1], [1], [0, 0, 0, 1, 1, 1], [0], [0]>} : vector<1x8x8xbf16>, vector<1x8x8xbf16>, vector<1x8x8xf32> -> vector<1x8x8xf32>
    %cst_36 = arith.constant -1.000000e+30 : f32
    "tpu.trace_stop"() : () -> ()
    %93 = vector.broadcast %cst_36 : f32 to vector<1x8x8xf32>
    %94 = arith.select %49, %93, %92 : vector<1x8x8xi1>, vector<1x8x8xf32>
    %cst_37 = arith.constant dense<0xFF800000> : vector<1x8xf32>
    %95 = vector.multi_reduction <maximumf>, %94, %cst_37 [2] : vector<1x8x8xf32> to vector<1x8xf32>
    %96 = vector.shape_cast %95 : vector<1x8xf32> to vector<1x8x1xf32>
    %97 = vector.broadcast %96 : vector<1x8x1xf32> to vector<1x8x8xf32>
    %98 = arith.subf %94, %97 : vector<1x8x8xf32>
    %99 = math.exp %98 : vector<1x8x8xf32>
    %cst_38 = arith.constant dense<0.000000e+00> : vector<1x8xf32>
    %100 = vector.multi_reduction <add>, %99, %cst_38 [2] : vector<1x8x8xf32> to vector<1x8xf32>
    %101 = vector.shape_cast %100 : vector<1x8xf32> to vector<1x8x1xf32>
    %102 = tpu.reciprocal %101 {approx = true} : vector<1x8x1xf32> -> vector<1x8x1xf32>
    %103 = vector.broadcast %102 : vector<1x8x1xf32> to vector<1x8x8xf32>
    %104 = arith.mulf %99, %103 : vector<1x8x8xf32>
    %105 = arith.truncf %104 : vector<1x8x8xf32> to vector<1x8x8xbf16>
    %106 = vector.extract_strided_slice %45 {offsets = [0, 0, 16], sizes = [1, 8, 8], strides = [1, 1, 1]} : vector<1x8x32xbf16> to vector<1x8x8xbf16>
    "tpu.trace_start"() <{level = 10 : i32, message = "bqk,bkd->bqd"}> : () -> ()
    %cst_39 = arith.constant dense<0.000000e+00> : vector<1x8x8xf32>
    %107 = tpu.matmul %105, %106, %cst_39 {dimension_numbers = #tpu.dot_dimension_numbers<[2], [1], [1], [2], [0, 0, 0, 1, 1, 2], [0], [0]>} : vector<1x8x8xbf16>, vector<1x8x8xbf16>, vector<1x8x8xf32> -> vector<1x8x8xf32>
    "tpu.trace_stop"() : () -> ()
    %108 = arith.truncf %107 : vector<1x8x8xf32> to vector<1x8x8xbf16>
    %c0_40 = arith.constant 0 : index
    %c0_41 = arith.constant 0 : index
    %c16 = arith.constant 16 : index
    %109 = vector.load %arg18[%c0_40, %c0_41, %c16] : memref<1x8x32xbf16, #tpu.memory_space<vmem>>, vector<1x8x8xbf16>
    tpu.vector_store %arg18[%c0_40, %c0_41, %c16], %108 {strides = array<i32>} : memref<1x8x32xbf16, #tpu.memory_space<vmem>>, vector<1x8x8xbf16>,
    %110 = vector.extract_strided_slice %43 {offsets = [0, 0, 24], sizes = [1, 8, 8], strides = [1, 1, 1]} : vector<1x8x32xbf16> to vector<1x8x8xbf16>
    %111 = vector.extract_strided_slice %44 {offsets = [0, 0, 24], sizes = [1, 8, 8], strides = [1, 1, 1]} : vector<1x8x32xbf16> to vector<1x8x8xbf16>
    "tpu.trace_start"() <{level = 10 : i32, message = "bqd,bkd->bqk"}> : () -> ()
    %cst_42 = arith.constant dense<0.000000e+00> : vector<1x8x8xf32>
    %112 = tpu.matmul %110, %111, %cst_42 {dimension_numbers = #tpu.dot_dimension_numbers<[2], [2], [1], [1], [0, 0, 0, 1, 1, 1], [0], [0]>} : vector<1x8x8xbf16>, vector<1x8x8xbf16>, vector<1x8x8xf32> -> vector<1x8x8xf32>
    %cst_43 = arith.constant -1.000000e+30 : f32
    "tpu.trace_stop"() : () -> ()
    %113 = vector.broadcast %cst_43 : f32 to vector<1x8x8xf32>
    %114 = arith.select %49, %113, %112 : vector<1x8x8xi1>, vector<1x8x8xf32>
    %cst_44 = arith.constant dense<0xFF800000> : vector<1x8xf32>
    %115 = vector.multi_reduction <maximumf>, %114, %cst_44 [2] : vector<1x8x8xf32> to vector<1x8xf32>
    %116 = vector.shape_cast %115 : vector<1x8xf32> to vector<1x8x1xf32>
    %117 = vector.broadcast %116 : vector<1x8x1xf32> to vector<1x8x8xf32>
    %118 = arith.subf %114, %117 : vector<1x8x8xf32>
    %119 = math.exp %118 : vector<1x8x8xf32>
    %cst_45 = arith.constant dense<0.000000e+00> : vector<1x8xf32>
    %120 = vector.multi_reduction <add>, %119, %cst_45 [2] : vector<1x8x8xf32> to vector<1x8xf32>
    %121 = vector.shape_cast %120 : vector<1x8xf32> to vector<1x8x1xf32>
    %122 = tpu.reciprocal %121 {approx = true} : vector<1x8x1xf32> -> vector<1x8x1xf32>
    %123 = vector.broadcast %122 : vector<1x8x1xf32> to vector<1x8x8xf32>
    %124 = arith.mulf %119, %123 : vector<1x8x8xf32>
    %125 = arith.truncf %124 : vector<1x8x8xf32> to vector<1x8x8xbf16>
    %126 = vector.extract_strided_slice %45 {offsets = [0, 0, 24], sizes = [1, 8, 8], strides = [1, 1, 1]} : vector<1x8x32xbf16> to vector<1x8x8xbf16>
    "tpu.trace_start"() <{level = 10 : i32, message = "bqk,bkd->bqd"}> : () -> ()
    %cst_46 = arith.constant dense<0.000000e+00> : vector<1x8x8xf32>
    %127 = tpu.matmul %125, %126, %cst_46 {dimension_numbers = #tpu.dot_dimension_numbers<[2], [1], [1], [2], [0, 0, 0, 1, 1, 2], [0], [0]>} : vector<1x8x8xbf16>, vector<1x8x8xbf16>, vector<1x8x8xf32> -> vector<1x8x8xf32>
    "tpu.trace_stop"() : () -> ()
    %128 = arith.truncf %127 : vector<1x8x8xf32> to vector<1x8x8xbf16>
    %c0_47 = arith.constant 0 : index
    %c0_48 = arith.constant 0 : index
    %c24 = arith.constant 24 : index
    %129 = vector.load %arg18[%c0_47, %c0_48, %c24] : memref<1x8x32xbf16, #tpu.memory_space<vmem>>, vector<1x8x8xbf16>
    tpu.vector_store %arg18[%c0_47, %c0_48, %c24], %128 {strides = array<i32>} : memref<1x8x32xbf16, #tpu.memory_space<vmem>>, vector<1x8x8xbf16>,
    %c0_49 = arith.constant 0 : index
    %c0_50 = arith.constant 0 : index
    %c0_51 = arith.constant 0 : index
    %130 = vector.load %arg18[%c0_49, %c0_50, %c0_51] : memref<1x8x32xbf16, #tpu.memory_space<vmem>>, vector<1x8x32xbf16>
    %131 = vector.shape_cast %130 : vector<1x8x32xbf16> to vector<8x32xbf16>
    %c0_52 = arith.constant 0 : index
    %c0_53 = arith.constant 0 : index
    %c0_54 = arith.constant 0 : index
    %132 = vector.load %arg8[%c0_52, %c0_53, %c0_54] : memref<1x32x32xbf16, #tpu.memory_space<vmem>>, vector<1x32x32xbf16>
    %133 = vector.shape_cast %132 : vector<1x32x32xbf16> to vector<32x32xbf16>
    %cst_55 = arith.constant dense<0.000000e+00> : vector<8x32xf32>
    %134 = tpu.matmul %131, %133, %cst_55 {dimension_numbers = #tpu.dot_dimension_numbers<[1], [0], [0], [1], [0, 0, 1, 1], [], []>} : vector<8x32xbf16>, vector<32x32xbf16>, vector<8x32xf32> -> vector<8x32xf32>
    %c0_56 = arith.constant 0 : index
    %c0_57 = arith.constant 0 : index
    %c0_58 = arith.constant 0 : index
    %135 = vector.load %arg9[%c0_56, %c0_57, %c0_58] : memref<1x1x32xf32, #tpu.memory_space<vmem>>, vector<1x1x32xf32>
    %136 = vector.shape_cast %135 : vector<1x1x32xf32> to vector<1x32xf32>
    %137 = vector.broadcast %136 : vector<1x32xf32> to vector<8x32xf32>
    %138 = arith.addf %134, %137 : vector<8x32xf32>
    %139 = vector.shape_cast %138 : vector<8x32xf32> to vector<1x8x32xf32>
    %140 = arith.addf %3, %139 : vector<1x8x32xf32>
    %c0_59 = arith.constant 0 : index
    %c0_60 = arith.constant 0 : index
    %c0_61 = arith.constant 0 : index
    %141 = vector.load %arg10[%c0_59, %c0_60, %c0_61] : memref<1x1x32xf32, #tpu.memory_space<vmem>>, vector<1x1x32xf32>
    %142 = vector.shape_cast %141 : vector<1x1x32xf32> to vector<1x32xf32>
    %c0_62 = arith.constant 0 : index
    %c0_63 = arith.constant 0 : index
    %c0_64 = arith.constant 0 : index
    %143 = vector.load %arg11[%c0_62, %c0_63, %c0_64] : memref<1x1x32xf32, #tpu.memory_space<vmem>>, vector<1x1x32xf32>
    %144 = vector.shape_cast %143 : vector<1x1x32xf32> to vector<1x32xf32>
    %cst_65 = arith.constant dense<0.000000e+00> : vector<1x8xf32>
    %145 = vector.multi_reduction <add>, %140, %cst_65 [2] : vector<1x8x32xf32> to vector<1x8xf32>
    %146 = vector.shape_cast %145 : vector<1x8xf32> to vector<1x8x1xf32>
    %cst_66 = arith.constant 3.200000e+01 : f32
    %147 = vector.broadcast %cst_66 : f32 to vector<1x8x1xf32>
    %148 = arith.divf %146, %147 : vector<1x8x1xf32>
    %149 = vector.broadcast %148 : vector<1x8x1xf32> to vector<1x8x32xf32>
    %150 = arith.subf %140, %149 : vector<1x8x32xf32>
    %151 = arith.mulf %150, %150 : vector<1x8x32xf32>
    %cst_67 = arith.constant dense<0.000000e+00> : vector<1x8xf32>
    %152 = vector.multi_reduction <add>, %151, %cst_67 [2] : vector<1x8x32xf32> to vector<1x8xf32>
    %153 = vector.shape_cast %152 : vector<1x8xf32> to vector<1x8x1xf32>
    %cst_68 = arith.constant 3.200000e+01 : f32
    %154 = vector.broadcast %cst_68 : f32 to vector<1x8x1xf32>
    %155 = arith.divf %153, %154 : vector<1x8x1xf32>
    %156 = vector.broadcast %148 : vector<1x8x1xf32> to vector<1x8x32xf32>
    %157 = arith.subf %140, %156 : vector<1x8x32xf32>
    %cst_69 = arith.constant 1.000000e-07 : f32
    %158 = vector.broadcast %cst_69 : f32 to vector<1x8x1xf32>
    %159 = arith.addf %155, %158 : vector<1x8x1xf32>
    %160 = math.rsqrt %159 : vector<1x8x1xf32>
    %161 = vector.broadcast %160 : vector<1x8x1xf32> to vector<1x8x32xf32>
    %162 = arith.mulf %157, %161 : vector<1x8x32xf32>
    %163 = vector.shape_cast %142 : vector<1x32xf32> to vector<1x1x32xf32>
    %164 = vector.broadcast %163 : vector<1x1x32xf32> to vector<1x8x32xf32>
    %165 = arith.mulf %162, %164 : vector<1x8x32xf32>
    %166 = vector.shape_cast %144 : vector<1x32xf32> to vector<1x1x32xf32>
    %167 = vector.broadcast %166 : vector<1x1x32xf32> to vector<1x8x32xf32>
    %168 = arith.addf %165, %167 : vector<1x8x32xf32>
    %169 = vector.shape_cast %168 : vector<1x8x32xf32> to vector<8x32xf32>
    %170 = arith.truncf %169 : vector<8x32xf32> to vector<8x32xbf16>
    %c0_70 = arith.constant 0 : index
    %c0_71 = arith.constant 0 : index
    %c0_72 = arith.constant 0 : index
    %171 = vector.load %arg12[%c0_70, %c0_71, %c0_72] : memref<1x32x128xbf16, #tpu.memory_space<vmem>>, vector<1x32x128xbf16>
    %172 = vector.shape_cast %171 : vector<1x32x128xbf16> to vector<32x128xbf16>
    %cst_73 = arith.constant dense<0.000000e+00> : vector<8x128xf32>
    %173 = tpu.matmul %170, %172, %cst_73 {dimension_numbers = #tpu.dot_dimension_numbers<[1], [0], [0], [1], [0, 0, 1, 1], [], []>} : vector<8x32xbf16>, vector<32x128xbf16>, vector<8x128xf32> -> vector<8x128xf32>
    %c0_74 = arith.constant 0 : index
    %c0_75 = arith.constant 0 : index
    %c0_76 = arith.constant 0 : index
    %174 = vector.load %arg13[%c0_74, %c0_75, %c0_76] : memref<1x1x128xf32, #tpu.memory_space<vmem>>, vector<1x1x128xf32>
    %175 = vector.shape_cast %174 : vector<1x1x128xf32> to vector<1x128xf32>
    %176 = vector.broadcast %175 : vector<1x128xf32> to vector<8x128xf32>
    %177 = arith.addf %173, %176 : vector<8x128xf32>
    %cst_77 = arith.constant 1.702000e+00 : f32
    %178 = vector.broadcast %cst_77 : f32 to vector<8x128xf32>
    %179 = arith.mulf %178, %177 : vector<8x128xf32>
    %180 = arith.negf %179 : vector<8x128xf32>
    %181 = math.exp %180 : vector<8x128xf32>
    %cst_78 = arith.constant 1.000000e+00 : f32
    %182 = vector.broadcast %cst_78 : f32 to vector<8x128xf32>
    %183 = arith.addf %182, %181 : vector<8x128xf32>
    %184 = arith.divf %182, %183 : vector<8x128xf32>
    %185 = arith.mulf %177, %184 : vector<8x128xf32>
    %186 = arith.truncf %185 : vector<8x128xf32> to vector<8x128xbf16>
    %c0_79 = arith.constant 0 : index
    %c0_80 = arith.constant 0 : index
    %c0_81 = arith.constant 0 : index
    %187 = vector.load %arg14[%c0_79, %c0_80, %c0_81] : memref<1x128x32xbf16, #tpu.memory_space<vmem>>, vector<1x128x32xbf16>
    %188 = vector.shape_cast %187 : vector<1x128x32xbf16> to vector<128x32xbf16>
    %cst_82 = arith.constant dense<0.000000e+00> : vector<8x32xf32>
    %189 = tpu.matmul %186, %188, %cst_82 {dimension_numbers = #tpu.dot_dimension_numbers<[1], [0], [0], [1], [0, 0, 1, 1], [], []>} : vector<8x128xbf16>, vector<128x32xbf16>, vector<8x32xf32> -> vector<8x32xf32>
    %c0_83 = arith.constant 0 : index
    %c0_84 = arith.constant 0 : index
    %c0_85 = arith.constant 0 : index
    %190 = vector.load %arg15[%c0_83, %c0_84, %c0_85] : memref<1x1x32xf32, #tpu.memory_space<vmem>>, vector<1x1x32xf32>
    %191 = vector.shape_cast %190 : vector<1x1x32xf32> to vector<1x32xf32>
    %192 = vector.broadcast %191 : vector<1x32xf32> to vector<8x32xf32>
    %193 = arith.addf %189, %192 : vector<8x32xf32>
    %194 = vector.shape_cast %193 : vector<8x32xf32> to vector<1x8x32xf32>
    %195 = arith.addf %140, %194 : vector<1x8x32xf32>
    %c0_86 = arith.constant 0 : index
    %c0_87 = arith.constant 0 : index
    %c0_88 = arith.constant 0 : index
    %196 = vector.load %arg17[%c0_86, %c0_87, %c0_88] : memref<1x8x32xf32, #tpu.memory_space<vmem>>, vector<1x8x32xf32>
    tpu.vector_store %arg17[%c0_86, %c0_87, %c0_88], %195 {strides = array<i32>} : memref<1x8x32xf32, #tpu.memory_space<vmem>>, vector<1x8x32xf32>,
    %c1_i32 = arith.constant 1 : i32
    %197 = arith.cmpi eq, %arg1, %c1_i32 : i32
    %198 = arith.extui %197 : i1 to i32
    %c0_i32_89 = arith.constant 0 : i32
    %199 = arith.cmpi ne, %198, %c0_i32_89 : i32
    scf.if %199 {
      %c0_90 = arith.constant 0 : index
      %c0_91 = arith.constant 0 : index
      %c0_92 = arith.constant 0 : index
      %200 = vector.load %arg3[%c0_90, %c0_91, %c0_92] : memref<1x8x1xf32, #tpu.memory_space<vmem>>, vector<1x8x1xf32>
      %201 = vector.broadcast %200 : vector<1x8x1xf32> to vector<1x8x32xf32>
      %202 = arith.mulf %201, %195 : vector<1x8x32xf32>
      %cst_93 = arith.constant dense<0.000000e+00> : vector<1x32xf32>
      %203 = vector.multi_reduction <add>, %202, %cst_93 [1] : vector<1x8x32xf32> to vector<1x32xf32>
      %204 = vector.shape_cast %203 : vector<1x32xf32> to vector<1x1x32xf32>
      %c0_94 = arith.constant 0 : index
      %c0_95 = arith.constant 0 : index
      %c0_96 = arith.constant 0 : index
      %205 = vector.load %arg16[%c0_94, %c0_95, %c0_96] : memref<1x1x32xf32, #tpu.memory_space<vmem>>, vector<1x1x32xf32>
      tpu.vector_store %arg16[%c0_94, %c0_95, %c0_96], %204 {strides = array<i32>} : memref<1x1x32xf32, #tpu.memory_space<vmem>>, vector<1x1x32xf32>,
    } else {
    }
    return
  }
  func.func @transform_0(%arg0: i32, %arg1: i32) -> (i32, i32, i32) {
    %c0_i32 = arith.constant 0 : i32
    %c0_i32_0 = arith.constant 0 : i32
    %c0_i32_1 = arith.constant 0 : i32
    return %arg0, %c0_i32, %c0_i32_0 : i32, i32, i32
  }
  func.func @transform_1(%arg0: i32, %arg1: i32) -> (i32, i32, i32) {
    %c0_i32 = arith.constant 0 : i32
    %c0_i32_0 = arith.constant 0 : i32
    %c0_i32_1 = arith.constant 0 : i32
    return %arg0, %c0_i32, %c0_i32_0 : i32, i32, i32
  }
  func.func @transform_2(%arg0: i32, %arg1: i32) -> (i32, i32, i32) {
    %c0_i32 = arith.constant 0 : i32
    %c0_i32_0 = arith.constant 0 : i32
    %c0_i32_1 = arith.constant 0 : i32
    return %arg1, %c0_i32, %c0_i32_0 : i32, i32, i32
  }
  func.func @transform_3(%arg0: i32, %arg1: i32) -> (i32, i32, i32) {
    %c0_i32 = arith.constant 0 : i32
    %c0_i32_0 = arith.constant 0 : i32
    %c0_i32_1 = arith.constant 0 : i32
    return %arg1, %c0_i32, %c0_i32_0 : i32, i32, i32
  }
  func.func @transform_4(%arg0: i32, %arg1: i32) -> (i32, i32, i32) {
    %c0_i32 = arith.constant 0 : i32
    %c0_i32_0 = arith.constant 0 : i32
    %c0_i32_1 = arith.constant 0 : i32
    return %arg1, %c0_i32, %c0_i32_0 : i32, i32, i32
  }
  func.func @transform_5(%arg0: i32, %arg1: i32) -> (i32, i32, i32) {
    %c0_i32 = arith.constant 0 : i32
    %c0_i32_0 = arith.constant 0 : i32
    %c0_i32_1 = arith.constant 0 : i32
    return %arg1, %c0_i32, %c0_i32_0 : i32, i32, i32
  }
  func.func @transform_6(%arg0: i32, %arg1: i32) -> (i32, i32, i32) {
    %c0_i32 = arith.constant 0 : i32
    %c0_i32_0 = arith.constant 0 : i32
    %c0_i32_1 = arith.constant 0 : i32
    return %arg1, %c0_i32, %c0_i32_0 : i32, i32, i32
  }
  func.func @transform_7(%arg0: i32, %arg1: i32) -> (i32, i32, i32) {
    %c0_i32 = arith.constant 0 : i32
    %c0_i32_0 = arith.constant 0 : i32
    %c0_i32_1 = arith.constant 0 : i32
    return %arg1, %c0_i32, %c0_i32_0 : i32, i32, i32
  }
  func.func @transform_8(%arg0: i32, %arg1: i32) -> (i32, i32, i32) {
    %c0_i32 = arith.constant 0 : i32
    %c0_i32_0 = arith.constant 0 : i32
    %c0_i32_1 = arith.constant 0 : i32
    return %arg1, %c0_i32, %c0_i32_0 : i32, i32, i32
  }
  func.func @transform_9(%arg0: i32, %arg1: i32) -> (i32, i32, i32) {
    %c0_i32 = arith.constant 0 : i32
    %c0_i32_0 = arith.constant 0 : i32
    %c0_i32_1 = arith.constant 0 : i32
    return %arg1, %c0_i32, %c0_i32_0 : i32, i32, i32
  }
  func.func @transform_10(%arg0: i32, %arg1: i32) -> (i32, i32, i32) {
    %c0_i32 = arith.constant 0 : i32
    %c0_i32_0 = arith.constant 0 : i32
    %c0_i32_1 = arith.constant 0 : i32
    return %arg1, %c0_i32, %c0_i32_0 : i32, i32, i32
  }
  func.func @transform_11(%arg0: i32, %arg1: i32) -> (i32, i32, i32) {
    %c0_i32 = arith.constant 0 : i32
    %c0_i32_0 = arith.constant 0 : i32
    %c0_i32_1 = arith.constant 0 : i32
    return %arg1, %c0_i32, %c0_i32_0 : i32, i32, i32
  }
  func.func @transform_12(%arg0: i32, %arg1: i32) -> (i32, i32, i32) {
    %c0_i32 = arith.constant 0 : i32
    %c0_i32_0 = arith.constant 0 : i32
    %c0_i32_1 = arith.constant 0 : i32
    return %arg1, %c0_i32, %c0_i32_0 : i32, i32, i32
  }
  func.func @transform_13(%arg0: i32, %arg1: i32) -> (i32, i32, i32) {
    %c0_i32 = arith.constant 0 : i32
    %c0_i32_0 = arith.constant 0 : i32
    %c0_i32_1 = arith.constant 0 : i32
    return %arg1, %c0_i32, %c0_i32_0 : i32, i32, i32
  }
  func.func @transform_14(%arg0: i32, %arg1: i32) -> (i32, i32, i32) {
    %c0_i32 = arith.constant 0 : i32
    %c0_i32_0 = arith.constant 0 : i32
    %c0_i32_1 = arith.constant 0 : i32
    return %arg0, %c0_i32, %c0_i32_0 : i32, i32, i32
  }
}

</mosaic_0001>

<bundles_post_ra>
// kernel: _lambda_.1
= control target key start
LH: loop header
LB: loop body
LE: loop exit
PB: predicated region body
PF: predicated region fallthrough
CT: control target
= control target key end

     0   :  { %s2183_s29 = smov 0   ;;  %s2185_s30 = smov 0   ;;  %s2472_s0 = inlined_call_operand.vmem [shape: f32[2,8,32], index: 0, kind: input, shape index: {}]   ;;  %s2473_s1 = inlined_call_operand.vmem [shape: f32[2,8,1], index: 1, kind: input, shape index: {}]   ;;  %s2474_s2 = inlined_call_operand.vmem [shape: f32[2,1,32], index: 2, kind: input, shape index: {}]   ;;  %s2475_s3 = inlined_call_operand.vmem [shape: f32[2,1,32], index: 3, kind: input, shape index: {}]   ;;  %s2476_s4 = inlined_call_operand.vmem [shape: bf16[2,32,96], index: 4, kind: input, shape index: {}]   ;;  %s2477_s5 = inlined_call_operand.vmem [shape: f32[2,1,96], index: 5, kind: input, shape index: {}]   ;;  %s2478_s6 = inlined_call_operand.vmem [shape: bf16[2,32,32], index: 6, kind: input, shape index: {}]   ;;  %s2479_s7 = inlined_call_operand.vmem [shape: f32[2,1,32], index: 7, kind: input, shape index: {}]   ;;  %s2480_s8 = inlined_call_operand.vmem [shape: f32[2,1,32], index: 8, kind: input, shape index: {}]   ;;  %s2481_s9 = inlined_call_operand.vmem [shape: f32[2,1,32], index: 9, kind: input, shape index: {}]   ;;  %s2482_s10 = inlined_call_operand.vmem [shape: bf16[2,32,128], index: 10, kind: input, shape index: {}]   ;;  %s2483_s11 = inlined_call_operand.vmem [shape: f32[2,1,128], index: 11, kind: input, shape index: {}]   ;;  %s2484_s12 = inlined_call_operand.vmem [shape: bf16[2,128,32], index: 12, kind: input, shape index: {}]   ;;  %s2485_s13 = inlined_call_operand.vmem [shape: f32[2,1,32], index: 13, kind: input, shape index: {}]   ;;  %s2486_s14 = inlined_call_operand.vmem [shape: f32[2,1,32], index: 14, kind: output, shape index: {}]  }
   0x1   :  { %2492 = sst [smem:[#allocation11_spill]] %s2472_s0  ;;  %s2187_s15 = smov 0  }
   0x2   :  { %2493 = sst [smem:[#allocation12_spill]] %s2473_s1  ;;  %s2189_s16 = smov 0  }
   0x3   :  { %2494 = sst [smem:[#allocation13_spill]] %s2476_s4  ;;  %s2191_s17 = smov 0  }
   0x4   :  { %2495 = sst [smem:[#allocation14_spill]] %s2478_s6 }
   0x5   :  { %2496 = sst [smem:[#allocation15_spill]] %s2484_s12 }
   0x6   :  { %2497 = sst [smem:[#allocation16_spill]] %s2485_s13 }
   0x7   :  { %2498 = sst [smem:[#allocation17_spill]] %s2486_s14 }
   0x8 LB: > { %2499 = sst [smem:[#allocation4_spill]] %s2073_s29  ;;  %s33_s18 = sadd.s32 1, %s2081_s15  ;;  %s2089_s17 = sphi %s2191_s17, %s24_s17   ;;  %s2085_s16 = sphi %s2189_s16, %s2528_s16   ;;  %s2081_s15 = sphi %s2187_s15, %s2527_s15   ;;  %s2077_s30 = sphi %s2185_s30, %s2526_s30   ;;  %s2073_s29 = sphi %s2183_s29, %s2525_s29  }
   0x9   : > { %2500 = sst [smem:[#allocation5_spill]] %s2081_s15  ;;  %s36_s19 = sadd.s32 1, %s2085_s16 }
   0xa   : > { %2501 = sst [smem:[#allocation6_spill]] %s2085_s16  ;;  %p34_p0 = scmp.ge.s32.totalorder %s33_s18, 2 }
   0xb   : > { %2502 = sst [smem:[#allocation7_spill]] %s2089_s17  ;;  %p1770_p1 = scmp.ge.s32.totalorder %s2089_s17, 1 }
   0xc   : > { %p536_p2 = scmp.lt.s32.totalorder %s2089_s17, 5  ;;  %s2530_s18 = smov (%p34_p0, %s33_s18), 0 }
   0xd   : > { %2503 = sst [smem:[#allocation8_spill]] %s2530_s18  ;;  %s2532_s19 = smov (!%p34_p0, %s36_s19), %s2085_s16 }
   0xe   : > { %p537_p3 = pnand %p1770_p1, %p536_p2  ;;  %p38_p4 = scmp.ge.s32.totalorder %s2532_s19, 2 }
  0x10   : > { %s2534_s19 = smov (%p38_p4, %s2532_s19), 0  ;;  %540 = sbr.rel (%p537_p3) target bundleno = 2639 (0xa4f), region = 76 }
  0x11   : > { %2504 = sst [smem:[#allocation9_spill]] %s2534_s19 }
  0x17   : > { %p627_p5 = scmp.lt.s32.totalorder %s2077_s30, 1  ;;  %p635_p6 = scmp.lt.s32.totalorder %s2073_s29, 1 }
  0x18   : > { %s2507_s0 = sld [smem:[#allocation11_spill]]  ;;  %s2508_s1 = sld [smem:[#allocation12_spill]] }
  0x19   : > { %s2536_s30 = smov (!%p627_p5, %s2077_s30), 1  ;;  %s2509_s4 = sld [smem:[#allocation13_spill]] }
  0x1a   : > { %2505 = sst [smem:[#allocation10_spill]] %s2536_s30  ;;  %s1771_s21 = sshll.u32 %s2536_s30, 3 }
  0x1b   : > { %s2219_s20 = scalar_select %p635_p6, %s2073_s29, 1 }
  0x1c   : > { %s2510_s6 = sld [smem:[#allocation14_spill]]  ;;  %s2511_s13 = sld [smem:[#allocation15_spill]] }
  0x1d   : > { %s1822_s22 = sshll.u32 %s2219_s20, 4  ;;  %s662_s25 = scalar_lea.vmem %s2481_s9, %s2219_s20 }
  0x1e   : > { %s630_s27 = scalar_lea.vmem %s2507_s0, %s1771_s21  ;;  %s2232_s18 = scalar_lea.vmem %s2508_s1, %s1771_s21 }
  0x1f   : > { %s2250_s14 = scalar_lea.vmem %s2509_s4, %s1822_s22  ;;  %s2272_s1 = scalar_lea.vmem %s2482_s10, %s1822_s22 }
  0x20   : > { %s670_s4 = scalar_lea.vmem %s2483_s11, %s2219_s20  ;;  %s2512_s17 = sld [smem:[#allocation16_spill]] }
  0x21   : > { %s2513_s23 = sld [smem:[#allocation4_spill]] }
  0x22   : > { %s2255_s28 = scalar_lea.vmem %s2510_s6, %s1822_s22  ;;  %s1825_s6 = sshll.u32 %s2219_s20, 6 }
  0x23   : > { %s2282_s30 = scalar_lea.vmem %s2511_s13, %s1825_s6 }
  0x26   : > { %s678_s24 = scalar_lea.vmem %s2512_s17, %s2219_s20 }
  0x27   : > { %p1781_p7 = scmp.ne.s32.totalorder %s2513_s23, 0 }
  0x28   : > { %v687_v0 = vld [vmem:[%s630_s27] sm:$0xff] (!%p1781_p7)  ;;  %vm688_vm0 = vcmask (!%p1781_p7), 261120  }
  0x29   : > { %686 = sbr.rel (%p1781_p7) target bundleno = 48 (0x30), region = 80  ;;  %689 = vst.msk [vmem:[#allocation2] sm:$0xff] (!%p1781_p7), %vm688_vm0, %v687_v0 }
  0x30 PF: > { %v2289_v1 = vld [vmem:[#allocation2] sm:$0xff]  ;;  %vm693_vm1 = vcmask 261120   ;;  %v2091_v9 = vmov 0.0   ;;  %vm2092_vm2 = vmmov 0   ;;  %v2013_v10 = vld [vmem:[%s2250_s14 + $0x8] sm:$0xff]   ;;  %s2515_s13 = scalar_lea.vmem %s2475_s3, %s2219_s20  ;;  %s2516_s19 = scalar_lea.vmem %s2477_s5, %s2219_s20  ;;  %vm798_vm3 = vcmask 64512  }
  0x31   : > { %v694_v2 = vsel %vm693_vm1, %v2289_v1, 0.0  ;;  %v2012_v8 = vld [vmem:[%s2250_s14] sm:$0xff]   ;;  %1863 = vmatprep.subr.bf16.mxu0 %v2091_v9  ;;  %1867 = vmatprep.mubr.msk.bf16.mxu0 %vm2092_vm2, %v2091_v9  ;;  %s2514_s14 = scalar_lea.vmem %s2474_s2, %s2219_s20  ;;  %s2093_s21 = smov 120   ;;  %v790_v39 = vlaneseq  ;;  %vm863_vm5 = vcmask 1043456   ;;  %vm908_vm6 = vcmask 60416  }
  0x32   : > { %695 = vadd.xlane.f32.xlu0 %v694_v2  ;;  %1864 = vmatpush3.bf16.msra.mxu0 %v2012_v8  ;;  %v1782_v15 = vld [vmem:[%s2514_s14] ss:$0 sm:$0xff]  ;;  %s2094_s15 = smov 96   ;;  %s2095_s16 = smov 88   ;;  %vm1028_vm7 = vcmask 126016   ;;  %vm1148_vm8 = vcmask 191616  }
  0x33   : > { %1883 = vmatprep.subr.bf16.mxu1 %v2091_v9  ;;  %1865 = vmatprep.subr.bf16.mxu0 %v2091_v9  ;;  %v1783_v17 = vld [vmem:[%s2515_s13] ss:$0 sm:$0xff]  ;;  %s2096_s12 = smov 80   ;;  %s2097_s29 = smov 112   ;;  %v791_v40 = vshrl.u32 %v790_v39, 7  ;;  %v793_v41 = vand.u32 127, %v790_v39 }
  0x34   : > { %1885 = vmatprep.mubr.msk.bf16.mxu1 %vm2092_vm2, %v2091_v9  ;;  %v1784_v21 = vld [vmem:[%s2516_s19] ss:$0 sm:$0xff]  ;;  %s2098_s23 = smov 72   ;;  %s2099_s6 = smov 104   ;;  %vm1268_vm9 = vcmask 257216  }
  0x35   : > { %vm794_vm4 = vcmp.gt.s32.totalorder %v793_v41, %v791_v40  ;;  %s2100_s17 = smov 64   ;;  %s2101_s14 = smov 56  }
  0x36   : > { %1866 = vmatpush3.bf16.msra.mxu0 %v2013_v10  ;;  %s2102_s27 = smov 48   ;;  %s2103_s22 = smov 40  }
  0x37   : > { %1871 = vmatprep.subr.bf16.mxu0 %v2091_v9  ;;  %s2104_s13 = smov 8   ;;  %s2105_s0 = smov 16  }
  0x38   : > { %s2106_s26 = smov 24  }
  0xbf   : > { %v696_v3 = vpop.xlane.xlu0 %695 }
  0xc0   : > { %v698_v4 = vmul.f32 0.03125, %v696_v3 }
  0xc2   : > { %v699_v5 = vsub.f32 %v2289_v1, %v698_v4 }
  0xc4   : > { %v700_v6 = vmul.f32 %v699_v5, %v699_v5 }
  0xc6   : > { %v701_v7 = vsel %vm693_vm1, %v700_v6, 0.0 }
  0xc7   : > { %702 = vadd.xlane.f32.xlu0 %v701_v7 }
 0x154   : > { %v703_v11 = vpop.xlane.xlu0 %702 }
 0x155   : > { %v704_v12 = vmul.f32 0.03125, %v703_v11 }
 0x157   : > { %v705_v13 = vadd.f32 1e-07, %v704_v12 }
 0x159   : > { %2026 = vrsqrt.f32 %v705_v13 }
 0x163   : > { %v2027_v14 = vpop.eup %2026 }
 0x164   : > { %v707_v16 = vmul.f32 %v2027_v14, %v699_v5 }
 0x166   : > { %v714_v18 = vmul.f32 %v1782_v15, %v707_v16 }
 0x168   : > { %v721_v19 = vadd.f32 %v1783_v17, %v714_v18 }
 0x16a   : > { %v722_v20 = vpack.c.bf16 %v721_v19, %v721_v19 }
 0x16c   : > { %1868 = vmatmul.mubr.msk.bf16.vlgmr.msra.gmra.mrb[0].mxu0 %vm693_vm1, %v722_v20 }
 0x16d   : > { %1873 = vmatprep.mubr.msk.bf16.mxu0 %vm2092_vm2, %v2091_v9 }
 0x23f   : > { %v783_v22 = vpop.f32.mrb[0].mxu0 }
 0x240   : > { %v784_v23 = vadd.f32 %v1784_v21, %v783_v22  ;;  %v1869_v24 = vpop.f32.mrb[1].mxu0 }
 0x241   : > { %v786_v25 = vpop.f32.mrb[2].mxu0 }
 0x242   : > { %v2323_v26 = vpack.c.bf16 %v784_v23, %v784_v23  ;;  %v1870_v27 = vpop.f32.mrb[3].mxu0 }
 0x244   : > { %910 = vrot.lane.b32.xlu0 %v2323_v26, %s2093_s21  ;;  %796 = vrot.lane.b32.xlu1 %v2323_v26, %s2094_s15  ;;  %s2517_s21 = scalar_lea.vmem %s2479_s7, %s2219_s20 }
 0x248   : > { %912 = vrot.lane.b32.xlu1 %v2323_v26, %s2095_s16 }
 0x24c   : > { %1032 = vrot.lane.b32.xlu1 %v2323_v26, %s2096_s12  ;;  %s2518_s12 = scalar_lea.vmem %s2480_s8, %s2219_s20 }
 0x250   : > { %1030 = vrot.lane.b32.xlu1 %v2323_v26, %s2097_s29 }
 0x254   : > { %1152 = vrot.lane.b32.xlu1 %v2323_v26, %s2098_s23 }
 0x258   : > { %1150 = vrot.lane.b32.xlu1 %v2323_v26, %s2099_s6 }
 0x2b6   : > { %v797_v28 = vpop.permute.xlu1 %796  ;;  %v911_v33 = vpop.permute.xlu0 %910 }
 0x2b7   : > { %v803_v29 = vsel %vm798_vm3, %v797_v28, 0 }
 0x2b8   : > { %1872 = vmatpush3.bf16.xpose.msra.mxu0 %v803_v29 }
 0x2b9   : > { %1877 = vmatprep.subr.bf16.mxu0 %v2091_v9 }
 0x2ba   : > { %v913_v30 = vpop.permute.xlu1 %912 }
 0x2bb   : > { %v918_v31 = vsel %vm798_vm3, %v913_v30, 0 }
 0x2bc   : > { %1884 = vmatpush3.bf16.xpose.msra.mxu1 %v918_v31 }
 0x2bd   : > { %1895 = vmatprep.subr.bf16.mxu1 %v2091_v9 }
 0x2be   : > { %v1033_v32 = vpop.permute.xlu1 %1032 }
 0x2bf   : > { %1874 = vmatmul.mubr.msk.bf16.vlgmr.msra.gmra.mrb[4].mxu0 %vm798_vm3, %v2323_v26  ;;  %v1038_v35 = vsel %vm798_vm3, %v1033_v32, 0 }
 0x2c0   : > { %1879 = vmatprep.mubr.msk.bf16.mxu0 %vm2092_vm2, %v2091_v9 }
 0x2c2   : > { %v1031_v34 = vpop.permute.xlu1 %1030 }
 0x2c3   : > { %1886 = vmatmul.mubr.msk.bf16.vlgmr.msra.gmra.mrb[0].mxu1 %vm798_vm3, %v911_v33 }
 0x2c4   : > { %1896 = vmatpush3.bf16.xpose.msra.mxu1 %v1038_v35  ;;  %1897 = vmatprep.mubr.msk.bf16.mxu1 %vm2092_vm2, %v2091_v9 }
 0x2c5   : > { %1907 = vmatprep.subr.bf16.mxu1 %v2091_v9 }
 0x2c6   : > { %v1153_v36 = vpop.permute.xlu1 %1152 }
 0x2c7   : > { %v1158_v37 = vsel %vm798_vm3, %v1153_v36, 0 }
 0x2ca   : > { %v1151_v38 = vpop.permute.xlu1 %1150 }
 0x2cb   : > { %1898 = vmatmul.mubr.msk.bf16.vlgmr.msra.gmra.mrb[4].mxu1 %vm798_vm3, %v1031_v34 }
 0x2cc   : > { %1908 = vmatpush3.bf16.xpose.msra.mxu1 %v1158_v37  ;;  %1909 = vmatprep.mubr.msk.bf16.mxu1 %vm2092_vm2, %v2091_v9 }
 0x2cd   : > { %1919 = vmatprep.subr.bf16.mxu1 %v2091_v9 }
 0x2d3   : > { %1910 = vmatmul.mubr.msk.bf16.vlgmr.msra.gmra.mrb[8].mxu1 %vm798_vm3, %v1151_v38 }
 0x2d4   : > { %1923 = vmatprep.mubr.msk.bf16.mxu1 %vm2092_vm2, %v2091_v9 }
 0x392   : > { %v839_v42 = vpop.f32.mrb[4].mxu0 }
 0x393   : > { %v845_v43 = vsel %vm794_vm4, -1e+30, %v839_v42  ;;  %v1875_v44 = vpop.f32.mrb[5].mxu0 }
 0x394   : > { %v842_v45 = vpop.f32.mrb[6].mxu0  ;;  %v846_v46 = vsel %vm798_vm3, %v845_v43, -inf }
 0x395   : > { %847 = vmax.xlane.f32.xlu1 %v846_v46  ;;  %v1876_v47 = vpop.f32.mrb[7].mxu0 }
 0x396   : > { %v954_v48 = vpop.f32.mrb[0].mxu1 }
 0x397   : > { %v960_v49 = vsel %vm794_vm4, -1e+30, %v954_v48  ;;  %v1887_v50 = vpop.f32.mrb[1].mxu1 }
 0x398   : > { %v957_v51 = vpop.f32.mrb[2].mxu1  ;;  %v961_v52 = vsel %vm798_vm3, %v960_v49, -inf }
 0x399   : > { %962 = vmax.xlane.f32.xlu0 %v961_v52  ;;  %v1888_v53 = vpop.f32.mrb[3].mxu1 }
 0x39e   : > { %v1074_v54 = vpop.f32.mrb[4].mxu1 }
 0x39f   : > { %v1080_v55 = vsel %vm794_vm4, -1e+30, %v1074_v54  ;;  %v1899_v56 = vpop.f32.mrb[5].mxu1 }
 0x3a0   : > { %v1077_v57 = vpop.f32.mrb[6].mxu1  ;;  %v1081_v58 = vsel %vm798_vm3, %v1080_v55, -inf }
 0x3a1   : > { %v1900_v59 = vpop.f32.mrb[7].mxu1  ;;  %1082 = vmax.xlane.f32.xlu1 %v1081_v58  ;;  %v2014_v58 = vld [vmem:[%s2255_s28] sm:$0xff]  }
 0x3a2   : > { %1920 = vmatpush3.bf16.msra.mxu1 %v2014_v58 }
 0x3a3   : > { %1921 = vmatprep.subr.bf16.mxu1 %v2091_v9 }
 0x3a6   : > { %v1194_v60 = vpop.f32.mrb[8].mxu1 }
 0x3a7   : > { %v1200_v61 = vsel %vm794_vm4, -1e+30, %v1194_v60  ;;  %v1911_v62 = vpop.f32.mrb[9].mxu1  ;;  %v2015_v60 = vld [vmem:[%s2255_s28 + $0x8] sm:$0xff]  }
 0x3a8   : > { %v1197_v63 = vpop.f32.mrb[10].mxu1  ;;  %v1201_v0 = vsel %vm798_vm3, %v1200_v61, -inf  ;;  %1922 = vmatpush3.bf16.msra.mxu1 %v2015_v60 }
 0x3a9   : > { %1202 = vmax.xlane.f32.xlu0 %v1201_v0  ;;  %v1912_v2 = vpop.f32.mrb[11].mxu1  ;;  %1935 = vmatprep.subr.bf16.mxu1 %v2091_v9 }
 0x422   : > { %v848_v3 = vpop.xlane.xlu1 %847 }
 0x423   : > { %v849_v4 = vsub.f32 %v845_v43, %v848_v3 }
 0x425   : > { %v850_v5 = vmul.f32 1.442695, %v849_v4 }
 0x426   : > { %v963_v6 = vpop.xlane.xlu0 %962 }
 0x427   : > { %2028 = vpow2.f32 %v850_v5  ;;  %v964_v7 = vsub.f32 %v960_v49, %v963_v6 }
 0x429   : > { %v965_v8 = vmul.f32 1.442695, %v964_v7 }
 0x42b   : > { %2030 = vpow2.f32 %v965_v8 }
 0x42e   : > { %v1083_v19 = vpop.xlane.xlu1 %1082 }
 0x42f   : > { %v1084_v20 = vsub.f32 %v1080_v55, %v1083_v19 }
 0x431   : > { %v2029_v10 = vpop.eup %2028  ;;  %v1085_v21 = vmul.f32 1.442695, %v1084_v20 }
 0x432   : > { %v852_v11 = vsel %vm798_vm3, %v2029_v10, 0.0 }
 0x433   : > { %853 = vadd.xlane.f32.xlu1 %v852_v11 }
 0x435   : > { %v2031_v12 = vpop.eup %2030 }
 0x436   : > { %v1203_v13 = vpop.xlane.xlu0 %1202  ;;  %v967_v14 = vsel %vm798_vm3, %v2031_v12, 0.0 }
 0x437   : > { %v1204_v15 = vsub.f32 %v1200_v61, %v1203_v13  ;;  %968 = vadd.xlane.f32.xlu0 %v967_v14 }
 0x439   : > { %v1205_v16 = vmul.f32 1.442695, %v1204_v15 }
 0x43b   : > { %2032 = vpow2.f32 %v1205_v16 }
 0x43c   : > { %2034 = vpow2.f32 %v1085_v21 }
 0x444   : > { %858 = vrot.lane.b32.xlu1 %v2323_v26, %s2100_s17 }
 0x445   : > { %v2033_v17 = vpop.eup %2032 }
 0x446   : > { %v1207_v18 = vsel %vm798_vm3, %v2033_v17, 0.0  ;;  %v2035_v22 = vpop.eup %2034 }
 0x447   : > { %1208 = vadd.xlane.f32.xlu0 %v1207_v18  ;;  %v1087_v23 = vsel %vm798_vm3, %v2035_v22, 0.0 }
 0x45d   : > { %973 = vrot.lane.b32.xlu0 %v2323_v26, %s2101_s14 }
 0x468   : > { %1088 = vadd.xlane.f32.xlu1 %v1087_v23 }
 0x479   : > { %1093 = vrot.lane.b32.xlu1 %v2323_v26, %s2102_s27 }
 0x47d   : > { %1213 = vrot.lane.b32.xlu1 %v2323_v26, %s2103_s22 }
 0x4c0   : > { %v854_v24 = vpop.xlane.xlu1 %853 }
 0x4c1   : > { %2036 = vrcp.f32 %v854_v24 }
 0x4c4   : > { %v859_v25 = vpop.permute.xlu1 %858  ;;  %v969_v28 = vpop.xlane.xlu0 %968 }
 0x4c5   : > { %v865_v27 = vsel %vm863_vm5, %v859_v25, 0  ;;  %2038 = vrcp.f32 %v969_v28  ;;  %v2016_v25 = vld [vmem:[%s2272_s1] sm:$0xff]  }
 0x4c6   : > { %1878 = vmatpush3.bf16.msra.mxu0 %v865_v27 }
 0x4c7   : > { %1889 = vmatprep.subr.bf16.mxu0 %v2091_v9 }
 0x4cb   : > { %v2037_v29 = vpop.eup %2036 }
 0x4cc   : > { %v856_v30 = vmul.f32 %v2037_v29, %v2029_v10 }
 0x4ce   : > { %v857_v31 = vpack.c.bf16 %v856_v30, %v856_v30 }
 0x4cf   : > { %v2039_v26 = vpop.eup %2038 }
 0x4d0   : > { %1880 = vmatmul.mubr.msk.bf16.vlgmr.msra.gmra.mrb[8].mxu0 %vm798_vm3, %v857_v31  ;;  %v971_v33 = vmul.f32 %v2039_v26, %v2031_v12  ;;  %v1799_v12 = vld [vmem:[%s2517_s21] ss:$0 sm:$0xff] }
 0x4d1   : > { %1891 = vmatprep.mubr.msk.bf16.mxu0 %vm2092_vm2, %v2091_v9  ;;  %v1803_v31 = vld [vmem:[%s2518_s12] ss:$0 sm:$0xff] }
 0x4d2   : > { %v972_v36 = vpack.c.bf16 %v971_v33, %v971_v33 }
 0x4d4   : > { %v1209_v32 = vpop.xlane.xlu0 %1208 }
 0x4d8   : > { %v974_v34 = vpop.permute.xlu0 %973 }
 0x4d9   : > { %v979_v35 = vsel %vm863_vm5, %v974_v34, 0 }
 0x4da   : > { %1890 = vmatpush3.bf16.msra.mxu0 %v979_v35 }
 0x4db   : > { %1901 = vmatprep.subr.bf16.mxu0 %v2091_v9 }
 0x4dd   : > { %1892 = vmatmul.mubr.msk.bf16.vlgmr.msra.gmra.mrb[12].mxu0 %vm798_vm3, %v972_v36  ;;  %v2018_v36 = vld [vmem:[%s2282_s30] sm:$0xff]  }
 0x4de   : > { %1903 = vmatprep.mubr.msk.bf16.mxu0 %vm2092_vm2, %v2091_v9 }
 0x4f5   : > { %v1089_v37 = vpop.xlane.xlu1 %1088 }
 0x4f6   : > { %2040 = vrcp.f32 %v1089_v37  ;;  %v2019_v37 = vld [vmem:[%s2282_s30 + $0x8] sm:$0xff]  }
 0x4f7   : > { %2042 = vrcp.f32 %v1209_v32  ;;  %v1804_v32 = vld [vmem:[%s662_s25] ss:$0 sm:$0xff] }
 0x4f9   : > { %v1094_v38 = vpop.permute.xlu1 %1093 }
 0x4fa   : > { %v1099_v39 = vsel %vm863_vm5, %v1094_v38, 0  ;;  %v2020_v38 = vld [vmem:[%s2282_s30 + $0x10] sm:$0xff]  }
 0x4fb   : > { %1902 = vmatpush3.bf16.msra.mxu0 %v1099_v39  ;;  %v2021_v39 = vld [vmem:[%s2282_s30 + $0x18] sm:$0xff]  }
 0x4fc   : > { %1913 = vmatprep.subr.bf16.mxu0 %v2091_v9 }
 0x4fd   : > { %v1214_v42 = vpop.permute.xlu1 %1213 }
 0x4fe   : > { %v1219_v45 = vsel %vm863_vm5, %v1214_v42, 0  ;;  %v2024_v42 = vld [vmem:[%s2282_s30 + $0x30] sm:$0xff]  }
 0x500   : > { %v2041_v40 = vpop.eup %2040 }
 0x501   : > { %v1091_v41 = vmul.f32 %v2041_v40, %v2035_v22  ;;  %v2043_v44 = vpop.eup %2042  ;;  %v2022_v40 = vld [vmem:[%s2282_s30 + $0x20] sm:$0xff]  }
 0x502   : > { %v1211_v46 = vmul.f32 %v2043_v44, %v2033_v17  ;;  %v1805_v44 = vld [vmem:[%s670_s4] ss:$0 sm:$0xff]  ;;  %s2520_s4 = sld [smem:[#allocation4_spill]] }
 0x503   : > { %v1092_v43 = vpack.c.bf16 %v1091_v41, %v1091_v41  ;;  %v2023_v41 = vld [vmem:[%s2282_s30 + $0x28] sm:$0xff]  }
 0x504   : > { %v1212_v47 = vpack.c.bf16 %v1211_v46, %v1211_v46 }
 0x505   : > { %1904 = vmatmul.mubr.msk.bf16.vlgmr.msra.gmra.mrb[16].mxu0 %vm798_vm3, %v1092_v43  ;;  %v2025_v43 = vld [vmem:[%s2282_s30 + $0x38] sm:$0xff]  }
 0x506   : > { %1914 = vmatpush3.bf16.msra.mxu0 %v1219_v45  ;;  %1915 = vmatprep.mubr.msk.bf16.mxu0 %vm2092_vm2, %v2091_v9 }
 0x507   : > { %1927 = vmatprep.subr.bf16.mxu0 %v2091_v9 }
 0x508   : > { %p1819_p8 = scmp.ne.s32.totalorder %s2520_s4, 1 }
 0x509   : > { %s2521_s14 = sld [smem:[#allocation10_spill]] (!%p1819_p8)  ;;  %vm1574_vm10 = vcmask (!%p1819_p8), 253952   ;;  %s2522_s27 = sld [smem:[#allocation17_spill]] (!%p1819_p8) }
 0x50d   : > { %1916 = vmatmul.mubr.msk.bf16.vlgmr.msra.gmra.mrb[20].mxu0 %vm798_vm3, %v1212_v47 }
 0x50e   : > { %1931 = vmatprep.mubr.msk.bf16.mxu0 %vm2092_vm2, %v2091_v9  ;;  %1928 = vmatpush3.bf16.msra.mxu0 %v2016_v25 }
 0x50f   : > { %1929 = vmatprep.subr.bf16.mxu0 %v2091_v9  ;;  %s2523_s22 = scalar_lea.vmem (!%p1819_p8), %s2522_s27, %s2521_s14 }
 0x5a3   : > { %v901_v48 = vpop.f32.mrb[8].mxu0 }
 0x5a4   : > { %v907_v49 = vpack.c.bf16 %v901_v48, %v901_v48  ;;  %v1881_v50 = vpop.f32.mrb[9].mxu0 }
 0x5a5   : > { %v904_v51 = vpop.f32.mrb[10].mxu0 }
 0x5a6   : > { %909 = vst.msk [vmem:[#allocation3] sm:$0xf] %vm908_vm6, %v907_v49  ;;  %v1882_v52 = vpop.f32.mrb[11].mxu0 }
 0x5b0   : > { %v1015_v53 = vpop.f32.mrb[12].mxu0 }
 0x5b1   : > { %v1826_v54 = vpack.c.bf16 %v1015_v53, %v1015_v53  ;;  %v1893_v55 = vpop.f32.mrb[13].mxu0 }
 0x5b2   : > { %v1018_v56 = vpop.f32.mrb[14].mxu0 }
 0x5b3   : > { %1025 = vrot.lane.b32.xlu0 %v1826_v54, %s2104_s13  ;;  %v1894_v57 = vpop.f32.mrb[15].mxu0  ;;  %v1810_v56 = vld [vmem:[%s678_s24] ss:$0 sm:$0xff] }
 0x5d8   : > { %v1135_v59 = vpop.f32.mrb[16].mxu0 }
 0x5d9   : > { %v1827_v61 = vpack.c.bf16 %v1135_v59, %v1135_v59  ;;  %v1905_v62 = vpop.f32.mrb[17].mxu0 }
 0x5da   : > { %v1138_v63 = vpop.f32.mrb[18].mxu0 }
 0x5db   : > { %1145 = vrot.lane.b32.xlu1 %v1827_v61, %s2105_s0  ;;  %v1906_v0 = vpop.f32.mrb[19].mxu0  ;;  %v1560_v63 = vld [vmem:[%s2232_s18] sm:$0xff] (!%p1819_p8) }
 0x5dc   : > { %v2107_v0 = vmov (!%p1819_p8), 0  }
 0x5dd   : > { %2050 = vset.pattern.permute.xlu0 (!%p1819_p8), %v2107_v0 }
 0x5e0   : > { %v1255_v2 = vpop.f32.mrb[20].mxu0 }
 0x5e1   : > { %v1828_v3 = vpack.c.bf16 %v1255_v2, %v1255_v2  ;;  %v1917_v4 = vpop.f32.mrb[21].mxu0 }
 0x5e2   : > { %v1258_v5 = vpop.f32.mrb[22].mxu0 }
 0x5e3   : > { %1265 = vrot.lane.b32.xlu0 %v1828_v3, %s2106_s26  ;;  %v1918_v6 = vpop.f32.mrb[23].mxu0 }
 0x625   : > { %v1026_v7 = vpop.permute.xlu0 %1025 }
 0x626   : > { %1029 = vst.msk [vmem:[#allocation3] sm:$0xf] %vm1028_vm7, %v1026_v7 }
 0x64d   : > { %v1146_v8 = vpop.permute.xlu1 %1145 }
 0x64e   : > { %1149 = vst.msk [vmem:[#allocation3] sm:$0xf] %vm1148_vm8, %v1146_v8 }
 0x655   : > { %v1266_v10 = vpop.permute.xlu0 %1265 }
 0x656   : > { %1269 = vst.msk [vmem:[#allocation3] sm:$0xf] %vm1268_vm9, %v1266_v10 }
 0x65d   : > { %v1270_v11 = vld [vmem:[#allocation3] sm:$0xf] }
 0x65e   : > { %1924 = vmatmul.mubr.msk.bf16.vlgmr.msra.gmra.mrb[12].mxu1 %vm693_vm1, %v1270_v11 }
 0x65f   : > { %1951 = vmatprep.mubr.msk.bf16.mxu1 %vm2092_vm2, %v2091_v9  ;;  %1936 = vmatpush3.bf16.msra.mxu1 %v2018_v36 }
 0x660   : > { %1937 = vmatprep.subr.bf16.mxu1 %v2091_v9 }
 0x663   : > { %1938 = vmatpush3.bf16.msra.mxu1 %v2019_v37 }
 0x664   : > { %1939 = vmatprep.subr.bf16.mxu1 %v2091_v9 }
 0x667   : > { %1940 = vmatpush3.bf16.msra.mxu1 %v2020_v38 }
 0x668   : > { %1941 = vmatprep.subr.bf16.mxu1 %v2091_v9 }
 0x66b   : > { %1942 = vmatpush3.bf16.msra.mxu1 %v2021_v39 }
 0x66c   : > { %1943 = vmatprep.subr.bf16.mxu1 %v2091_v9 }
 0x66f   : > { %1944 = vmatpush3.bf16.msra.mxu1 %v2022_v40 }
 0x670   : > { %1945 = vmatprep.subr.bf16.mxu1 %v2091_v9 }
 0x673   : > { %1946 = vmatpush3.bf16.msra.mxu1 %v2023_v41 }
 0x674   : > { %1947 = vmatprep.subr.bf16.mxu1 %v2091_v9 }
 0x677   : > { %1948 = vmatpush3.bf16.msra.mxu1 %v2024_v42 }
 0x678   : > { %1949 = vmatprep.subr.bf16.mxu1 %v2091_v9 }
 0x67b   : > { %1950 = vmatpush3.bf16.msra.mxu1 %v2025_v43 }
 0x731   : > { %v1331_v13 = vpop.f32.mrb[12].mxu1 }
 0x732   : > { %v1332_v14 = vadd.f32 %v1799_v12, %v1331_v13  ;;  %v1925_v15 = vpop.f32.mrb[13].mxu1 }
 0x733   : > { %v1334_v16 = vpop.f32.mrb[14].mxu1 }
 0x734   : > { %v2402_v17 = vadd.f32 %v1332_v14, %v2289_v1  ;;  %v1926_v18 = vpop.f32.mrb[15].mxu1  ;;  %v2017_v1 = vld [vmem:[%s2272_s1 + $0x8] sm:$0xff]  }
 0x735   : > { %1930 = vmatpush3.bf16.msra.mxu0 %v2017_v1 }
 0x736   : > { %v1340_v19 = vsel %vm693_vm1, %v2402_v17, 0.0 }
 0x737   : > { %1341 = vadd.xlane.f32.xlu1 %v1340_v19 }
 0x7c4   : > { %v1342_v20 = vpop.xlane.xlu1 %1341 }
 0x7c5   : > { %v1343_v21 = vmul.f32 0.03125, %v1342_v20 }
 0x7c7   : > { %v1344_v22 = vsub.f32 %v2402_v17, %v1343_v21 }
 0x7c9   : > { %v1345_v23 = vmul.f32 %v1344_v22, %v1344_v22 }
 0x7cb   : > { %v1346_v24 = vsel %vm693_vm1, %v1345_v23, 0.0 }
 0x7cc   : > { %1347 = vadd.xlane.f32.xlu0 %v1346_v24 }
 0x7e2   : > { %1563 = vperm.xlu0 (!%p1819_p8), %2050, %v1560_v63  }
 0x859   : > { %v1348_v27 = vpop.xlane.xlu0 %1347 }
 0x85a   : > { %v1349_v28 = vmul.f32 0.03125, %v1348_v27 }
 0x85c   : > { %v1350_v29 = vadd.f32 1e-07, %v1349_v28 }
 0x85e   : > { %2044 = vrsqrt.f32 %v1350_v29 }
 0x861   : > { %v1564_v2 = vpop.permute.xlu0 (!%p1819_p8), %1563 }
 0x868   : > { %v2045_v30 = vpop.eup %2044 }
 0x869   : > { %v1352_v26 = vmul.f32 %v2045_v30, %v1344_v22 }
 0x86b   : > { %v1359_v33 = vmul.f32 %v1803_v31, %v1352_v26 }
 0x86d   : > { %v1366_v34 = vadd.f32 %v1804_v32, %v1359_v33 }
 0x86f   : > { %v1367_v35 = vpack.c.bf16 %v1366_v34, %v1366_v34 }
 0x871   : > { %1932 = vmatmul.mubr.msk.bf16.vlgmr.msra.gmra.mrb[24].mxu0 %vm693_vm1, %v1367_v35 }
 0x944   : > { %v1428_v45 = vpop.f32.mrb[24].mxu0 }
 0x945   : > { %v1429_v46 = vadd.f32 %v1805_v44, %v1428_v45  ;;  %v1933_v47 = vpop.f32.mrb[25].mxu0 }
 0x946   : > { %v1431_v48 = vpop.f32.mrb[26].mxu0 }
 0x947   : > { %v1809_v49 = vmul.f32 -1.702, %v1429_v46  ;;  %v1934_v50 = vpop.f32.mrb[27].mxu0 }
 0x949   : > { %v1436_v51 = vmul.f32 1.442695, %v1809_v49 }
 0x94b   : > { %2046 = vpow2.f32 %v1436_v51 }
 0x955   : > { %v2047_v52 = vpop.eup %2046 }
 0x956   : > { %v1438_v53 = vadd.f32 1.0, %v2047_v52 }
 0x958   : > { %2048 = vrcp.f32 %v1438_v53 }
 0x962   : > { %v2049_v9 = vpop.eup %2048 }
 0x963   : > { %v1441_v54 = vmul.f32 %v2049_v9, %v1429_v46 }
 0x965   : > { %v1442_v55 = vpack.c.bf16 %v1441_v54, %v1441_v54 }
 0x967   : > { %1952 = vmatmul.mubr.bf16.vlgmr.msra.gmra.mrb[16].mxu1 %v1442_v55 }
 0xa39   : > { %1559 = sbr.rel (%p1819_p8) target bundleno = 2639 (0xa4f), region = 84 }
 0xa3a   : > { %v1548_v57 = vpop.f32.mrb[16].mxu1 }
 0xa3b   : > { %v1549_v58 = vadd.f32 %v1810_v56, %v1548_v57  ;;  %v1953_v59 = vpop.f32.mrb[17].mxu1 }
 0xa3c   : > { %v1551_v60 = vpop.f32.mrb[18].mxu1 }
 0xa3d   : > { %v1554_v61 = vadd.f32 %v1549_v58, %v2402_v17  ;;  %v1954_v62 = vpop.f32.mrb[19].mxu1 }
 0xa3f   : > { %1555 = vst.msk [vmem:[#allocation2] sm:$0xff] %vm693_vm1, %v1554_v61  ;;  %v1566_v3 = vmul.f32 (!%p1819_p8), %v1564_v2, %v1554_v61 }
 0xa41   : > { %v1567_v4 = vsel %vm693_vm1, %v1566_v3, 0.0 }
 0xa42   : > { %v1568_v5 = vrot.slane %v1567_v4, 4 }
 0xa44   : > { %v1569_v6 = vadd.f32 %v1568_v5, %v1567_v4 }
 0xa46   : > { %v1570_v7 = vrot.slane %v1569_v6, 2 }
 0xa48   : > { %v1571_v8 = vadd.f32 %v1570_v7, %v1569_v6 }
 0xa4a   : > { %v1572_v10 = vrot.slane %v1571_v8, 1 }
 0xa4c   : > { %v1573_v11 = vadd.f32 %v1572_v10, %v1571_v8 }
 0xa4e   : > { %1575 = vst.msk [vmem:[%s2523_s22] sm:$0x1] %vm1574_vm10, %v1573_v11 }
 0xa4f PF: > { %s2524_s18 = sld [smem:[#allocation7_spill]]  ;;  %s2525_s29 = sld [smem:[#allocation5_spill]] }
 0xa50   : > { %s2526_s30 = sld [smem:[#allocation6_spill]]  ;;  %s2527_s15 = sld [smem:[#allocation8_spill]] }
 0xa51   : > { %s2528_s16 = sld [smem:[#allocation9_spill]] }
 0xa55   : > { %s24_s17 = sadd.s32 1, %s2524_s18  }
 0xa56   : > { %p21_p9 = scmp.ge.s32.totalorder %s24_s17, 6  }
 0xa58   :  { %23 = sbr.rel (!%p21_p9) target bundleno = 8 (0x8), region = 153 }

</bundles_post_ra>
